<compile_context>
chip_gen: v6e
topology: v6e:2x2x1
jax: 0.10.0
libtpu: 0.0.40
codegen_flags: <defaults>
</compile_context>

<pallas_src>
import jax
import jax.numpy as jnp
from jax import lax
from jax.experimental import pallas as pl
from jax.experimental.pallas import tpu as pltpu


# ----------------------------------------------------------------------------
# Stage 1 (grid (N, Hin/THin)): per row-block of the *pre*-H-upsample tensor
#   T[n, ky, hi, co, w] = sum_{kx,ci,wi} uwp[w+kx, wi] * x[n, hi, wi, ci] * W[ky, kx, ci, co]
# One small channel matmul (K=Cin) per (kx, ky) tap + one W-contraction per tap.
# No lane slicing of computed values -> no relayout filler in the VLIW schedule.
# ----------------------------------------------------------------------------
def _stage1_kernel(x_ref, wr_ref, uw3_ref, t_ref):
    # x_ref:   (1, THin*Win, Cin)
    # wr_ref:  (3, 3, Cin, Cout)    [kx, ky, ci, co]
    # uw3_ref: (3, Wout, Win)       uw3[kx, w, wi] = uwp[w+kx, wi]  (conv W-pad folded in)
    # t_ref:   (1, 3, THin, Cout, Wout)
    _, _, THin, Cout, Wout = t_ref.shape
    Win = uw3_ref.shape[2]
    cdt = uw3_ref.dtype

    for ky in range(3):
        acc = jnp.zeros((THin, Cout, Wout), jnp.float32)
        for kx in range(3):
            fk = jnp.dot(x_ref[0], wr_ref[kx, ky],
                         preferred_element_type=jnp.float32)     # (THin*Win, Cout)
            fk = fk.reshape(THin, Win, Cout).astype(cdt)
            # contract over wi -> (THin, Cout, Wout): already T's (hi, co, w) layout
            acc = acc + lax.dot_general(
                fk, uw3_ref[kx],
                dimension_numbers=(((1,), (1,)), ((), ())),
                preferred_element_type=jnp.float32)
        t_ref[0, ky] = acc.astype(t_ref.dtype)


# ----------------------------------------------------------------------------
# Pass A (grid (N, CB, HB), all parallel): BN partial sums only.
# One lane-dense matmul per tile: (TH, 3*Hin) @ (3*Hin, TCW); no y is stored.
# ----------------------------------------------------------------------------
def _stats_kernel(t_ref, uh_ref, stat_ref):
    # t_ref:   (1, 3*Hin, TCW)     resident across the hb axis
    # uh_ref:  (TH, 3*Hin)         uh3[h, ky*Hin+hi] = uhp[h+ky, hi]
    # stat_ref:(1, 1, 2, TCW)      per-tile column sum / sum-of-squares
    y = jnp.dot(uh_ref[...], t_ref[0], preferred_element_type=jnp.float32)
    s = jnp.sum(y, axis=0, keepdims=True)
    ss = jnp.sum(y * y, axis=0, keepdims=True)
    stat_ref[0, 0] = jnp.concatenate([s, ss], axis=0)


# ----------------------------------------------------------------------------
# Pass B (grid (N, CB, HB), all parallel): recompute y = uh @ t, apply BN
# scale/bias + ReLU, and write straight into the NCHW output (transpose folded
# into the output BlockSpec; per-channel slices of y avoid any in-kernel
# major-axis transpose).
# ----------------------------------------------------------------------------
def _out_kernel(t_ref, uh_ref, scale_ref, bias_ref, o_ref):
    # t_ref:    (1, 3*Hin, TCW)      TCW = TCb*Wout columns of the channel block
    # uh_ref:   (TH, 3*Hin)
    # scale_ref/bias_ref: (1, TCW)   per-column (= per-channel, repeated) affine
    # o_ref:    (1, TCb, TH, Wout)   -> block of the (N, Cout, Hout, Wout) output
    _, TCb, TH, Wout = o_ref.shape
    y = jnp.dot(uh_ref[...], t_ref[0], preferred_element_type=jnp.float32)
    y = jnp.maximum(y * scale_ref[...] + bias_ref[...], 0.0)
    for tc in range(TCb):
        o_ref[0, tc] = y[:, tc * Wout:(tc + 1) * Wout].astype(o_ref.dtype)


def _bilinear_matrix_align_corners(n_in, n_out):
    """(n_out, n_in) matrix M s.t. M @ v bilinearly upsamples v (align_corners=True)."""
    if n_out == 1:
        src = jnp.zeros((1,), jnp.float32)
    else:
        src = jnp.arange(n_out, dtype=jnp.float32) * ((n_in - 1) / (n_out - 1))
    lo = jnp.clip(jnp.floor(src).astype(jnp.int32), 0, n_in - 1)
    hi = jnp.minimum(lo + 1, n_in - 1)
    frac = src - lo.astype(jnp.float32)
    rows = jnp.arange(n_out)
    U = jnp.zeros((n_out, n_in), jnp.float32)
    U = U.at[rows, lo].add(1.0 - frac)
    U = U.at[rows, hi].add(frac)
    return U


def _vmem_limit_bytes():
    """Per-chip VMEM budget: headroom on v7x (64 MiB), larger on v5e/v6e (128 MiB)."""
    try:
        cap = int(getattr(pltpu.get_tpu_info(), "vmem_capacity_bytes", 0))
    except Exception:
        cap = 0
    if cap <= 0:
        return 64 * 1024 * 1024                 # conservative, proven-safe default
    return min(int(cap * 0.8), 112 * 1024 * 1024)


def up_conv_forward(x_nchw, w_hwio, gamma, beta, scale, *,
                    compute_dtype=jnp.float32,
                    intermediate_dtype=jnp.bfloat16):
    """Forward of up_conv. x_nchw: (N, Cin, H, W) float32 (PyTorch layout)."""
    N, Cin, Hin, Win = x_nchw.shape
    Hout, Wout = Hin * scale, Win * scale
    Cout = w_hwio.shape[-1]
    CW = Cout * Wout
    t_dtype = compute_dtype if intermediate_dtype is None else intermediate_dtype

    # ---- glue: layouts + fused interpolation matrices (parameter setup) ----
    x_r = jnp.transpose(x_nchw, (0, 2, 3, 1)).reshape(N, Hin * Win, Cin)
    x_r = x_r.astype(compute_dtype)
    # conv weight as (kx, ky, Cin, Cout)
    wr = jnp.transpose(w_hwio, (1, 0, 2, 3)).astype(compute_dtype)
    # W-interp with conv zero-pad rows; kx taps folded in: uw3[kx, w, wi] = uwp[w+kx, wi]
    uwp = jnp.pad(_bilinear_matrix_align_corners(Win, Wout), ((1, 1), (0, 0)))
    uw3 = jnp.stack([uwp[kx:kx + Wout] for kx in range(3)], axis=0).astype(compute_dtype)
    # H-interp with conv zero-pad rows; ky taps folded in: uh3[h, ky*Hin+hi] = uhp[h+ky, hi]
    uhp = jnp.pad(_bilinear_matrix_align_corners(Hin, Hout), ((1, 1), (0, 0)))
    uh3 = jnp.concatenate([uhp[ky:ky + Hout] for ky in range(3)], axis=1).astype(t_dtype)

    # ---- tile selection ----
    THin = Hin
    for cand in (32, 16, 8):
        if Hin % cand == 0:
            THin = cand
            break
    HinB = Hin // THin

    TH = Hout
    for cand in (256, 128, 64, 32, 16, 8):      # fill the MXU rows on v6e/v7x
        if Hout % cand == 0:
            TH = cand
            break
    HB = Hout // TH

    # channel block: smallest group whose lane width is a 128-multiple, then grown
    # (bounded) to amortize per-grid-step overhead; fallback = full CW (valid spec).
    TC0 = Cout
    for t in range(1, Cout + 1):
        if Cout % t == 0 and (t * Wout) % 128 == 0:
            TC0 = t
            break
    TCb = TC0
    while (TCb * 2 * Wout <= 2048) and (Cout % (TCb * 2) == 0) and (TCb * 2 <= 64):
        TCb *= 2
    TCW = TCb * Wout
    CB = CW // TCW

    vmem_limit = _vmem_limit_bytes()

    # ---- stage 1: per-(batch, row-block) intermediate T ----
    t5 = pl.pallas_call(
        _stage1_kernel,
        out_shape=jax.ShapeDtypeStruct((N, 3, Hin, Cout, Wout), t_dtype),
        grid_spec=pltpu.PrefetchScalarGridSpec(
            num_scalar_prefetch=0,
            grid=(N, HinB),
            in_specs=[
                pl.BlockSpec((1, THin * Win, Cin), lambda n, hb: (n, hb, 0)),
                pl.BlockSpec((3, 3, Cin, Cout), lambda n, hb: (0, 0, 0, 0)),
                pl.BlockSpec((3, Wout, Win), lambda n, hb: (0, 0, 0)),
            ],
            out_specs=pl.BlockSpec((1, 3, THin, Cout, Wout),
                                   lambda n, hb: (n, 0, hb, 0, 0)),
        ),
        compiler_params=pltpu.CompilerParams(
            dimension_semantics=("parallel", "parallel"),
            vmem_limit_bytes=vmem_limit),
    )(x_r, wr, uw3)

    # free (row-major) reshape: (N, 3, Hin, Cout, Wout) -> (N, 3*Hin, Cout*Wout)
    t2 = t5.reshape(N, 3 * Hin, CW)

    isz = jnp.dtype(t_dtype).itemsize
    mm_flops = 2 * N * Hout * (3 * Hin) * CW
    stats_bytes = (N * 3 * Hin * CW * isz + N * CB * Hout * 3 * Hin * isz
                   + N * HB * 2 * CW * 4)
    out_bytes = (N * 3 * Hin * CW * isz + N * CB * Hout * 3 * Hin * isz
                 + N * Cout * Hout * Wout * 4)

    # ---- pass A: BN partial sums only (no conv output is materialized) ----
    stats = pl.pallas_call(
        _stats_kernel,
        out_shape=jax.ShapeDtypeStruct((N, HB, 2, CW), jnp.float32),
        grid_spec=pltpu.PrefetchScalarGridSpec(
            num_scalar_prefetch=0,
            grid=(N, CB, HB),
            in_specs=[
                pl.BlockSpec((1, 3 * Hin, TCW), lambda n, cb, hb: (n, 0, cb)),
                pl.BlockSpec((TH, 3 * Hin), lambda n, cb, hb: (hb, 0)),
            ],
            out_specs=pl.BlockSpec((1, 1, 2, TCW),
                                   lambda n, cb, hb: (n, hb, 0, cb)),
        ),
        compiler_params=pltpu.CompilerParams(
            dimension_semantics=("parallel", "parallel", "parallel"),
            vmem_limit_bytes=vmem_limit),
        cost_estimate=pl.CostEstimate(flops=mm_flops, transcendentals=0,
                                      bytes_accessed=stats_bytes),
    )(t2, uh3)

    # ---- tiny JAX glue: global train-mode BN statistics from the partials ----
    count = float(N * Hout * Wout)
    col_sum = jnp.sum(stats[:, :, 0, :], axis=(0, 1))           # (Cout*Wout,)
    col_sqs = jnp.sum(stats[:, :, 1, :], axis=(0, 1))
    ch_sum = col_sum.reshape(Cout, Wout).sum(axis=1)
    ch_sqs = col_sqs.reshape(Cout, Wout).sum(axis=1)
    mean = ch_sum / count
    var = jnp.maximum(ch_sqs / count - mean * mean, 0.0)        # biased variance
    inv = lax.rsqrt(var + 1e-5)
    scale_c = gamma.astype(jnp.float32) * inv
    bias_c = beta.astype(jnp.float32) - mean * scale_c
    scale_cols = jnp.repeat(scale_c, Wout).reshape(1, CW)       # column = co*Wout + w
    bias_cols = jnp.repeat(bias_c, Wout).reshape(1, CW)

    # ---- pass B: recompute conv output, BN + ReLU, write NCHW directly ----
    out = pl.pallas_call(
        _out_kernel,
        out_shape=jax.ShapeDtypeStruct((N, Cout, Hout, Wout), jnp.float32),
        grid_spec=pltpu.PrefetchScalarGridSpec(
            num_scalar_prefetch=0,
            grid=(N, CB, HB),
            in_specs=[
                pl.BlockSpec((1, 3 * Hin, TCW), lambda n, cb, hb: (n, 0, cb)),
                pl.BlockSpec((TH, 3 * Hin), lambda n, cb, hb: (hb, 0)),
                pl.BlockSpec((1, TCW), lambda n, cb, hb: (0, cb)),
                pl.BlockSpec((1, TCW), lambda n, cb, hb: (0, cb)),
            ],
            out_specs=pl.BlockSpec((1, TCb, TH, Wout),
                                   lambda n, cb, hb: (n, cb, hb, 0)),
        ),
        compiler_params=pltpu.CompilerParams(
            dimension_semantics=("parallel", "parallel", "parallel"),
            vmem_limit_bytes=vmem_limit),
        cost_estimate=pl.CostEstimate(flops=mm_flops, transcendentals=0,
                                      bytes_accessed=out_bytes),
    )(t2, uh3, scale_cols, bias_cols)

    return out                                                  # (N, Cout, Hout, Wout)


def up_conv_reference(x_nchw, w_hwio, gamma, beta, scale):
    """Pure-JAX reference (gather-based bilinear + lax.conv + train-mode BN + ReLU)."""
    N, Cin, H, W = x_nchw.shape
    Ho, Wo = H * scale, W * scale

    def coords(n_in, n_out):
        if n_out == 1:
            return jnp.zeros((1,), jnp.float32)
        return jnp.arange(n_out, dtype=jnp.float32) * ((n_in - 1) / (n_out - 1))

    ys, xs = coords(H, Ho), coords(W, Wo)
    y0 = jnp.clip(jnp.floor(ys).astype(jnp.int32), 0, H - 1)
    y1 = jnp.minimum(y0 + 1, H - 1)
    fy = ys - y0.astype(jnp.float32)
    x0 = jnp.clip(jnp.floor(xs).astype(jnp.int32), 0, W - 1)
    x1 = jnp.minimum(x0 + 1, W - 1)
    fx = xs - x0.astype(jnp.float32)

    top, bot = x_nchw[:, :, y0, :], x_nchw[:, :, y1, :]
    rows = top * (1.0 - fy)[None, None, :, None] + bot * fy[None, None, :, None]
    up = rows[:, :, :, x0] * (1.0 - fx) + rows[:, :, :, x1] * fx   # (N, C, Ho, Wo)

    w_oihw = jnp.transpose(w_hwio, (3, 2, 0, 1))
    conv = jax.lax.conv_general_dilated(
        up, w_oihw, window_strides=(1, 1), padding=((1, 1), (1, 1)),
        dimension_numbers=("NCHW", "OIHW", "NCHW"))

    mean = jnp.mean(conv, axis=(0, 2, 3), keepdims=True)
    var = jnp.mean(jnp.square(conv - mean), axis=(0, 2, 3), keepdims=True)
    y = (conv - mean) * jax.lax.rsqrt(var + 1e-5)
    y = y * gamma[None, :, None, None] + beta[None, :, None, None]
    return jnp.maximum(y, 0.0)


if __name__ == "__main__":
    key = jax.random.PRNGKey(0)
    k1, k2, k3, k4 = jax.random.split(key, 4)

    N, Cin, Cout, Hin, Win, scale = 2, 4, 8, 8, 8, 2

    x = jax.random.normal(k1, (N, Cin, Hin, Win), jnp.float32)
    # deterministic synthetic parameters (module __init__ defines the shapes)
    w_hwio = 0.1 * jax.random.normal(k2, (3, 3, Cin, Cout), jnp.float32)  # Conv2d weight
    gamma = 1.0 + 0.1 * jax.random.normal(k3, (Cout,), jnp.float32)       # BN weight
    beta = 0.1 * jax.random.normal(k4, (Cout,), jnp.float32)              # BN bias

    ref = up_conv_reference(x, w_hwio, gamma, beta, scale)

    # strict f32 path (f32 matmul inputs, f32 intermediate)
    out_f32 = jax.block_until_ready(
        up_conv_forward(x, w_hwio, gamma, beta, scale,
                        compute_dtype=jnp.float32, intermediate_dtype=jnp.float32))
    assert out_f32.shape == (N, Cout, Hin * scale, Win * scale)
    err = float(jnp.max(jnp.abs(out_f32 - ref)))
    if not (err < 1e-3):
        raise AssertionError(f"f32 mismatch vs reference: max abs err = {err}")

    # recommended production path: f32 matmul inputs, bf16 intermediate t (default)
    out_def = jax.block_until_ready(up_conv_forward(x, w_hwio, gamma, beta, scale))
    err_def = float(jnp.max(jnp.abs(out_def - ref)))
    if not (err_def < 5e-2):
        raise AssertionError(f"bf16-intermediate mismatch: max abs err = {err_def}")

    # full bf16 matmul-input path (f32 accumulation / stats / epilogue throughout)
    out_bf16 = jax.block_until_ready(
        up_conv_forward(x, w_hwio, gamma, beta, scale, compute_dtype=jnp.bfloat16))
    err_bf16 = float(jnp.max(jnp.abs(out_bf16 - ref)))
    if not (err_bf16 < 5e-2):
        raise AssertionError(f"bf16 mismatch vs reference: max abs err = {err_bf16}")

    print("KERNEL_OK")
</pallas_src>

<mosaic_0001>
module attributes {stable_mosaic.version = 11 : i64} {
  func.func @_stage1_kernel(%arg0: i32, %arg1: i32, %arg2: memref<1x64x4xf32, #tpu.memory_space<vmem>>, %arg3: memref<3x3x4x8xf32, #tpu.memory_space<vmem>>, %arg4: memref<3x16x8xf32, #tpu.memory_space<vmem>>, %arg5: memref<1x3x8x8x16xf32, #tpu.memory_space<vmem>>) attributes {dimension_semantics = [#tpu.dimension_semantics<parallel>, #tpu.dimension_semantics<parallel>], iteration_bounds = array<i64: 2, 1>, scalar_prefetch = 0 : i64, scratch_operands = 0 : i64, tpu.core_type = #tpu.core_type<tc>, window_params = [{transform_indices = @transform_0, window_bounds = array<i64: 1, 64, 4>}, {pipeline_mode = #tpu.pipeline_mode<synchronous>, transform_indices = @transform_1, window_bounds = array<i64: 3, 3, 4, 8>}, {pipeline_mode = #tpu.pipeline_mode<synchronous>, transform_indices = @transform_2, window_bounds = array<i64: 3, 16, 8>}, {transform_indices = @transform_3, window_bounds = array<i64: 1, 3, 8, 8, 16>}]} {
    %cst = arith.constant 0.000000e+00 : f32
    %0 = vector.broadcast %cst : f32 to vector<8x8x16xf32>
    %c0 = arith.constant 0 : index
    %c0_0 = arith.constant 0 : index
    %c0_1 = arith.constant 0 : index
    %1 = vector.load %arg2[%c0, %c0_0, %c0_1] : memref<1x64x4xf32, #tpu.memory_space<vmem>>, vector<1x64x4xf32>
    %2 = vector.shape_cast %1 : vector<1x64x4xf32> to vector<64x4xf32>
    %c0_2 = arith.constant 0 : index
    %c0_3 = arith.constant 0 : index
    %c0_4 = arith.constant 0 : index
    %c0_5 = arith.constant 0 : index
    %3 = vector.load %arg3[%c0_2, %c0_3, %c0_4, %c0_5] : memref<3x3x4x8xf32, #tpu.memory_space<vmem>>, vector<1x1x4x8xf32>
    %4 = vector.shape_cast %3 : vector<1x1x4x8xf32> to vector<4x8xf32>
    %cst_6 = arith.constant dense<0.000000e+00> : vector<64x8xf32>
    %5 = tpu.matmul %2, %4, %cst_6 {dimension_numbers = #tpu.dot_dimension_numbers<[1], [0], [0], [1], [0, 0, 1, 1], [], []>} : vector<64x4xf32>, vector<4x8xf32>, vector<64x8xf32> -> vector<64x8xf32>
    %6 = vector.shape_cast %5 : vector<64x8xf32> to vector<8x8x8xf32>
    %c0_7 = arith.constant 0 : index
    %c0_8 = arith.constant 0 : index
    %c0_9 = arith.constant 0 : index
    %7 = vector.load %arg4[%c0_7, %c0_8, %c0_9] : memref<3x16x8xf32, #tpu.memory_space<vmem>>, vector<1x16x8xf32>
    %8 = vector.shape_cast %7 : vector<1x16x8xf32> to vector<16x8xf32>
    %cst_10 = arith.constant dense<0.000000e+00> : vector<8x8x16xf32>
    %9 = tpu.matmul %6, %8, %cst_10 {dimension_numbers = #tpu.dot_dimension_numbers<[1], [1], [0, 2], [0], [0, 0, 0, 2, 1, 0], [], []>} : vector<8x8x8xf32>, vector<16x8xf32>, vector<8x8x16xf32> -> vector<8x8x16xf32>
    %10 = arith.addf %0, %9 : vector<8x8x16xf32>
    %c0_11 = arith.constant 0 : index
    %c0_12 = arith.constant 0 : index
    %c0_13 = arith.constant 0 : index
    %11 = vector.load %arg2[%c0_11, %c0_12, %c0_13] : memref<1x64x4xf32, #tpu.memory_space<vmem>>, vector<1x64x4xf32>
    %12 = vector.shape_cast %11 : vector<1x64x4xf32> to vector<64x4xf32>
    %c1 = arith.constant 1 : index
    %c0_14 = arith.constant 0 : index
    %c0_15 = arith.constant 0 : index
    %c0_16 = arith.constant 0 : index
    %13 = vector.load %arg3[%c1, %c0_14, %c0_15, %c0_16] : memref<3x3x4x8xf32, #tpu.memory_space<vmem>>, vector<1x1x4x8xf32>
    %14 = vector.shape_cast %13 : vector<1x1x4x8xf32> to vector<4x8xf32>
    %cst_17 = arith.constant dense<0.000000e+00> : vector<64x8xf32>
    %15 = tpu.matmul %12, %14, %cst_17 {dimension_numbers = #tpu.dot_dimension_numbers<[1], [0], [0], [1], [0, 0, 1, 1], [], []>} : vector<64x4xf32>, vector<4x8xf32>, vector<64x8xf32> -> vector<64x8xf32>
    %16 = vector.shape_cast %15 : vector<64x8xf32> to vector<8x8x8xf32>
    %c1_18 = arith.constant 1 : index
    %c0_19 = arith.constant 0 : index
    %c0_20 = arith.constant 0 : index
    %17 = vector.load %arg4[%c1_18, %c0_19, %c0_20] : memref<3x16x8xf32, #tpu.memory_space<vmem>>, vector<1x16x8xf32>
    %18 = vector.shape_cast %17 : vector<1x16x8xf32> to vector<16x8xf32>
    %cst_21 = arith.constant dense<0.000000e+00> : vector<8x8x16xf32>
    %19 = tpu.matmul %16, %18, %cst_21 {dimension_numbers = #tpu.dot_dimension_numbers<[1], [1], [0, 2], [0], [0, 0, 0, 2, 1, 0], [], []>} : vector<8x8x8xf32>, vector<16x8xf32>, vector<8x8x16xf32> -> vector<8x8x16xf32>
    %20 = arith.addf %10, %19 : vector<8x8x16xf32>
    %c0_22 = arith.constant 0 : index
    %c0_23 = arith.constant 0 : index
    %c0_24 = arith.constant 0 : index
    %21 = vector.load %arg2[%c0_22, %c0_23, %c0_24] : memref<1x64x4xf32, #tpu.memory_space<vmem>>, vector<1x64x4xf32>
    %22 = vector.shape_cast %21 : vector<1x64x4xf32> to vector<64x4xf32>
    %c2 = arith.constant 2 : index
    %c0_25 = arith.constant 0 : index
    %c0_26 = arith.constant 0 : index
    %c0_27 = arith.constant 0 : index
    %23 = vector.load %arg3[%c2, %c0_25, %c0_26, %c0_27] : memref<3x3x4x8xf32, #tpu.memory_space<vmem>>, vector<1x1x4x8xf32>
    %24 = vector.shape_cast %23 : vector<1x1x4x8xf32> to vector<4x8xf32>
    %cst_28 = arith.constant dense<0.000000e+00> : vector<64x8xf32>
    %25 = tpu.matmul %22, %24, %cst_28 {dimension_numbers = #tpu.dot_dimension_numbers<[1], [0], [0], [1], [0, 0, 1, 1], [], []>} : vector<64x4xf32>, vector<4x8xf32>, vector<64x8xf32> -> vector<64x8xf32>
    %26 = vector.shape_cast %25 : vector<64x8xf32> to vector<8x8x8xf32>
    %c2_29 = arith.constant 2 : index
    %c0_30 = arith.constant 0 : index
    %c0_31 = arith.constant 0 : index
    %27 = vector.load %arg4[%c2_29, %c0_30, %c0_31] : memref<3x16x8xf32, #tpu.memory_space<vmem>>, vector<1x16x8xf32>
    %28 = vector.shape_cast %27 : vector<1x16x8xf32> to vector<16x8xf32>
    %cst_32 = arith.constant dense<0.000000e+00> : vector<8x8x16xf32>
    %29 = tpu.matmul %26, %28, %cst_32 {dimension_numbers = #tpu.dot_dimension_numbers<[1], [1], [0, 2], [0], [0, 0, 0, 2, 1, 0], [], []>} : vector<8x8x8xf32>, vector<16x8xf32>, vector<8x8x16xf32> -> vector<8x8x16xf32>
    %30 = arith.addf %20, %29 : vector<8x8x16xf32>
    %c0_33 = arith.constant 0 : index
    %c0_34 = arith.constant 0 : index
    %c0_35 = arith.constant 0 : index
    %c0_36 = arith.constant 0 : index
    %c0_37 = arith.constant 0 : index
    %31 = vector.load %arg5[%c0_33, %c0_34, %c0_35, %c0_36, %c0_37] : memref<1x3x8x8x16xf32, #tpu.memory_space<vmem>>, vector<1x1x8x8x16xf32>
    %32 = vector.shape_cast %31 : vector<1x1x8x8x16xf32> to vector<8x8x16xf32>
    %33 = vector.shape_cast %30 : vector<8x8x16xf32> to vector<1x1x8x8x16xf32>
    tpu.vector_store %arg5[%c0_33, %c0_34, %c0_35, %c0_36, %c0_37], %33 {strides = array<i32>} : memref<1x3x8x8x16xf32, #tpu.memory_space<vmem>>, vector<1x1x8x8x16xf32>,
    %cst_38 = arith.constant 0.000000e+00 : f32
    %34 = vector.broadcast %cst_38 : f32 to vector<8x8x16xf32>
    %c0_39 = arith.constant 0 : index
    %c0_40 = arith.constant 0 : index
    %c0_41 = arith.constant 0 : index
    %35 = vector.load %arg2[%c0_39, %c0_40, %c0_41] : memref<1x64x4xf32, #tpu.memory_space<vmem>>, vector<1x64x4xf32>
    %36 = vector.shape_cast %35 : vector<1x64x4xf32> to vector<64x4xf32>
    %c0_42 = arith.constant 0 : index
    %c1_43 = arith.constant 1 : index
    %c0_44 = arith.constant 0 : index
    %c0_45 = arith.constant 0 : index
    %37 = vector.load %arg3[%c0_42, %c1_43, %c0_44, %c0_45] : memref<3x3x4x8xf32, #tpu.memory_space<vmem>>, vector<1x1x4x8xf32>
    %38 = vector.shape_cast %37 : vector<1x1x4x8xf32> to vector<4x8xf32>
    %cst_46 = arith.constant dense<0.000000e+00> : vector<64x8xf32>
    %39 = tpu.matmul %36, %38, %cst_46 {dimension_numbers = #tpu.dot_dimension_numbers<[1], [0], [0], [1], [0, 0, 1, 1], [], []>} : vector<64x4xf32>, vector<4x8xf32>, vector<64x8xf32> -> vector<64x8xf32>
    %40 = vector.shape_cast %39 : vector<64x8xf32> to vector<8x8x8xf32>
    %c0_47 = arith.constant 0 : index
    %c0_48 = arith.constant 0 : index
    %c0_49 = arith.constant 0 : index
    %41 = vector.load %arg4[%c0_47, %c0_48, %c0_49] : memref<3x16x8xf32, #tpu.memory_space<vmem>>, vector<1x16x8xf32>
    %42 = vector.shape_cast %41 : vector<1x16x8xf32> to vector<16x8xf32>
    %cst_50 = arith.constant dense<0.000000e+00> : vector<8x8x16xf32>
    %43 = tpu.matmul %40, %42, %cst_50 {dimension_numbers = #tpu.dot_dimension_numbers<[1], [1], [0, 2], [0], [0, 0, 0, 2, 1, 0], [], []>} : vector<8x8x8xf32>, vector<16x8xf32>, vector<8x8x16xf32> -> vector<8x8x16xf32>
    %44 = arith.addf %34, %43 : vector<8x8x16xf32>
    %c0_51 = arith.constant 0 : index
    %c0_52 = arith.constant 0 : index
    %c0_53 = arith.constant 0 : index
    %45 = vector.load %arg2[%c0_51, %c0_52, %c0_53] : memref<1x64x4xf32, #tpu.memory_space<vmem>>, vector<1x64x4xf32>
    %46 = vector.shape_cast %45 : vector<1x64x4xf32> to vector<64x4xf32>
    %c1_54 = arith.constant 1 : index
    %c1_55 = arith.constant 1 : index
    %c0_56 = arith.constant 0 : index
    %c0_57 = arith.constant 0 : index
    %47 = vector.load %arg3[%c1_54, %c1_55, %c0_56, %c0_57] : memref<3x3x4x8xf32, #tpu.memory_space<vmem>>, vector<1x1x4x8xf32>
    %48 = vector.shape_cast %47 : vector<1x1x4x8xf32> to vector<4x8xf32>
    %cst_58 = arith.constant dense<0.000000e+00> : vector<64x8xf32>
    %49 = tpu.matmul %46, %48, %cst_58 {dimension_numbers = #tpu.dot_dimension_numbers<[1], [0], [0], [1], [0, 0, 1, 1], [], []>} : vector<64x4xf32>, vector<4x8xf32>, vector<64x8xf32> -> vector<64x8xf32>
    %50 = vector.shape_cast %49 : vector<64x8xf32> to vector<8x8x8xf32>
    %c1_59 = arith.constant 1 : index
    %c0_60 = arith.constant 0 : index
    %c0_61 = arith.constant 0 : index
    %51 = vector.load %arg4[%c1_59, %c0_60, %c0_61] : memref<3x16x8xf32, #tpu.memory_space<vmem>>, vector<1x16x8xf32>
    %52 = vector.shape_cast %51 : vector<1x16x8xf32> to vector<16x8xf32>
    %cst_62 = arith.constant dense<0.000000e+00> : vector<8x8x16xf32>
    %53 = tpu.matmul %50, %52, %cst_62 {dimension_numbers = #tpu.dot_dimension_numbers<[1], [1], [0, 2], [0], [0, 0, 0, 2, 1, 0], [], []>} : vector<8x8x8xf32>, vector<16x8xf32>, vector<8x8x16xf32> -> vector<8x8x16xf32>
    %54 = arith.addf %44, %53 : vector<8x8x16xf32>
    %c0_63 = arith.constant 0 : index
    %c0_64 = arith.constant 0 : index
    %c0_65 = arith.constant 0 : index
    %55 = vector.load %arg2[%c0_63, %c0_64, %c0_65] : memref<1x64x4xf32, #tpu.memory_space<vmem>>, vector<1x64x4xf32>
    %56 = vector.shape_cast %55 : vector<1x64x4xf32> to vector<64x4xf32>
    %c2_66 = arith.constant 2 : index
    %c1_67 = arith.constant 1 : index
    %c0_68 = arith.constant 0 : index
    %c0_69 = arith.constant 0 : index
    %57 = vector.load %arg3[%c2_66, %c1_67, %c0_68, %c0_69] : memref<3x3x4x8xf32, #tpu.memory_space<vmem>>, vector<1x1x4x8xf32>
    %58 = vector.shape_cast %57 : vector<1x1x4x8xf32> to vector<4x8xf32>
    %cst_70 = arith.constant dense<0.000000e+00> : vector<64x8xf32>
    %59 = tpu.matmul %56, %58, %cst_70 {dimension_numbers = #tpu.dot_dimension_numbers<[1], [0], [0], [1], [0, 0, 1, 1], [], []>} : vector<64x4xf32>, vector<4x8xf32>, vector<64x8xf32> -> vector<64x8xf32>
    %60 = vector.shape_cast %59 : vector<64x8xf32> to vector<8x8x8xf32>
    %c2_71 = arith.constant 2 : index
    %c0_72 = arith.constant 0 : index
    %c0_73 = arith.constant 0 : index
    %61 = vector.load %arg4[%c2_71, %c0_72, %c0_73] : memref<3x16x8xf32, #tpu.memory_space<vmem>>, vector<1x16x8xf32>
    %62 = vector.shape_cast %61 : vector<1x16x8xf32> to vector<16x8xf32>
    %cst_74 = arith.constant dense<0.000000e+00> : vector<8x8x16xf32>
    %63 = tpu.matmul %60, %62, %cst_74 {dimension_numbers = #tpu.dot_dimension_numbers<[1], [1], [0, 2], [0], [0, 0, 0, 2, 1, 0], [], []>} : vector<8x8x8xf32>, vector<16x8xf32>, vector<8x8x16xf32> -> vector<8x8x16xf32>
    %64 = arith.addf %54, %63 : vector<8x8x16xf32>
    %c0_75 = arith.constant 0 : index
    %c1_76 = arith.constant 1 : index
    %c0_77 = arith.constant 0 : index
    %c0_78 = arith.constant 0 : index
    %c0_79 = arith.constant 0 : index
    %65 = vector.load %arg5[%c0_75, %c1_76, %c0_77, %c0_78, %c0_79] : memref<1x3x8x8x16xf32, #tpu.memory_space<vmem>>, vector<1x1x8x8x16xf32>
    %66 = vector.shape_cast %65 : vector<1x1x8x8x16xf32> to vector<8x8x16xf32>
    %67 = vector.shape_cast %64 : vector<8x8x16xf32> to vector<1x1x8x8x16xf32>
    tpu.vector_store %arg5[%c0_75, %c1_76, %c0_77, %c0_78, %c0_79], %67 {strides = array<i32>} : memref<1x3x8x8x16xf32, #tpu.memory_space<vmem>>, vector<1x1x8x8x16xf32>,
    %cst_80 = arith.constant 0.000000e+00 : f32
    %68 = vector.broadcast %cst_80 : f32 to vector<8x8x16xf32>
    %c0_81 = arith.constant 0 : index
    %c0_82 = arith.constant 0 : index
    %c0_83 = arith.constant 0 : index
    %69 = vector.load %arg2[%c0_81, %c0_82, %c0_83] : memref<1x64x4xf32, #tpu.memory_space<vmem>>, vector<1x64x4xf32>
    %70 = vector.shape_cast %69 : vector<1x64x4xf32> to vector<64x4xf32>
    %c0_84 = arith.constant 0 : index
    %c2_85 = arith.constant 2 : index
    %c0_86 = arith.constant 0 : index
    %c0_87 = arith.constant 0 : index
    %71 = vector.load %arg3[%c0_84, %c2_85, %c0_86, %c0_87] : memref<3x3x4x8xf32, #tpu.memory_space<vmem>>, vector<1x1x4x8xf32>
    %72 = vector.shape_cast %71 : vector<1x1x4x8xf32> to vector<4x8xf32>
    %cst_88 = arith.constant dense<0.000000e+00> : vector<64x8xf32>
    %73 = tpu.matmul %70, %72, %cst_88 {dimension_numbers = #tpu.dot_dimension_numbers<[1], [0], [0], [1], [0, 0, 1, 1], [], []>} : vector<64x4xf32>, vector<4x8xf32>, vector<64x8xf32> -> vector<64x8xf32>
    %74 = vector.shape_cast %73 : vector<64x8xf32> to vector<8x8x8xf32>
    %c0_89 = arith.constant 0 : index
    %c0_90 = arith.constant 0 : index
    %c0_91 = arith.constant 0 : index
    %75 = vector.load %arg4[%c0_89, %c0_90, %c0_91] : memref<3x16x8xf32, #tpu.memory_space<vmem>>, vector<1x16x8xf32>
    %76 = vector.shape_cast %75 : vector<1x16x8xf32> to vector<16x8xf32>
    %cst_92 = arith.constant dense<0.000000e+00> : vector<8x8x16xf32>
    %77 = tpu.matmul %74, %76, %cst_92 {dimension_numbers = #tpu.dot_dimension_numbers<[1], [1], [0, 2], [0], [0, 0, 0, 2, 1, 0], [], []>} : vector<8x8x8xf32>, vector<16x8xf32>, vector<8x8x16xf32> -> vector<8x8x16xf32>
    %78 = arith.addf %68, %77 : vector<8x8x16xf32>
    %c0_93 = arith.constant 0 : index
    %c0_94 = arith.constant 0 : index
    %c0_95 = arith.constant 0 : index
    %79 = vector.load %arg2[%c0_93, %c0_94, %c0_95] : memref<1x64x4xf32, #tpu.memory_space<vmem>>, vector<1x64x4xf32>
    %80 = vector.shape_cast %79 : vector<1x64x4xf32> to vector<64x4xf32>
    %c1_96 = arith.constant 1 : index
    %c2_97 = arith.constant 2 : index
    %c0_98 = arith.constant 0 : index
    %c0_99 = arith.constant 0 : index
    %81 = vector.load %arg3[%c1_96, %c2_97, %c0_98, %c0_99] : memref<3x3x4x8xf32, #tpu.memory_space<vmem>>, vector<1x1x4x8xf32>
    %82 = vector.shape_cast %81 : vector<1x1x4x8xf32> to vector<4x8xf32>
    %cst_100 = arith.constant dense<0.000000e+00> : vector<64x8xf32>
    %83 = tpu.matmul %80, %82, %cst_100 {dimension_numbers = #tpu.dot_dimension_numbers<[1], [0], [0], [1], [0, 0, 1, 1], [], []>} : vector<64x4xf32>, vector<4x8xf32>, vector<64x8xf32> -> vector<64x8xf32>
    %84 = vector.shape_cast %83 : vector<64x8xf32> to vector<8x8x8xf32>
    %c1_101 = arith.constant 1 : index
    %c0_102 = arith.constant 0 : index
    %c0_103 = arith.constant 0 : index
    %85 = vector.load %arg4[%c1_101, %c0_102, %c0_103] : memref<3x16x8xf32, #tpu.memory_space<vmem>>, vector<1x16x8xf32>
    %86 = vector.shape_cast %85 : vector<1x16x8xf32> to vector<16x8xf32>
    %cst_104 = arith.constant dense<0.000000e+00> : vector<8x8x16xf32>
    %87 = tpu.matmul %84, %86, %cst_104 {dimension_numbers = #tpu.dot_dimension_numbers<[1], [1], [0, 2], [0], [0, 0, 0, 2, 1, 0], [], []>} : vector<8x8x8xf32>, vector<16x8xf32>, vector<8x8x16xf32> -> vector<8x8x16xf32>
    %88 = arith.addf %78, %87 : vector<8x8x16xf32>
    %c0_105 = arith.constant 0 : index
    %c0_106 = arith.constant 0 : index
    %c0_107 = arith.constant 0 : index
    %89 = vector.load %arg2[%c0_105, %c0_106, %c0_107] : memref<1x64x4xf32, #tpu.memory_space<vmem>>, vector<1x64x4xf32>
    %90 = vector.shape_cast %89 : vector<1x64x4xf32> to vector<64x4xf32>
    %c2_108 = arith.constant 2 : index
    %c2_109 = arith.constant 2 : index
    %c0_110 = arith.constant 0 : index
    %c0_111 = arith.constant 0 : index
    %91 = vector.load %arg3[%c2_108, %c2_109, %c0_110, %c0_111] : memref<3x3x4x8xf32, #tpu.memory_space<vmem>>, vector<1x1x4x8xf32>
    %92 = vector.shape_cast %91 : vector<1x1x4x8xf32> to vector<4x8xf32>
    %cst_112 = arith.constant dense<0.000000e+00> : vector<64x8xf32>
    %93 = tpu.matmul %90, %92, %cst_112 {dimension_numbers = #tpu.dot_dimension_numbers<[1], [0], [0], [1], [0, 0, 1, 1], [], []>} : vector<64x4xf32>, vector<4x8xf32>, vector<64x8xf32> -> vector<64x8xf32>
    %94 = vector.shape_cast %93 : vector<64x8xf32> to vector<8x8x8xf32>
    %c2_113 = arith.constant 2 : index
    %c0_114 = arith.constant 0 : index
    %c0_115 = arith.constant 0 : index
    %95 = vector.load %arg4[%c2_113, %c0_114, %c0_115] : memref<3x16x8xf32, #tpu.memory_space<vmem>>, vector<1x16x8xf32>
    %96 = vector.shape_cast %95 : vector<1x16x8xf32> to vector<16x8xf32>
    %cst_116 = arith.constant dense<0.000000e+00> : vector<8x8x16xf32>
    %97 = tpu.matmul %94, %96, %cst_116 {dimension_numbers = #tpu.dot_dimension_numbers<[1], [1], [0, 2], [0], [0, 0, 0, 2, 1, 0], [], []>} : vector<8x8x8xf32>, vector<16x8xf32>, vector<8x8x16xf32> -> vector<8x8x16xf32>
    %98 = arith.addf %88, %97 : vector<8x8x16xf32>
    %c0_117 = arith.constant 0 : index
    %c2_118 = arith.constant 2 : index
    %c0_119 = arith.constant 0 : index
    %c0_120 = arith.constant 0 : index
    %c0_121 = arith.constant 0 : index
    %99 = vector.load %arg5[%c0_117, %c2_118, %c0_119, %c0_120, %c0_121] : memref<1x3x8x8x16xf32, #tpu.memory_space<vmem>>, vector<1x1x8x8x16xf32>
    %100 = vector.shape_cast %99 : vector<1x1x8x8x16xf32> to vector<8x8x16xf32>
    %101 = vector.shape_cast %98 : vector<8x8x16xf32> to vector<1x1x8x8x16xf32>
    tpu.vector_store %arg5[%c0_117, %c2_118, %c0_119, %c0_120, %c0_121], %101 {strides = array<i32>} : memref<1x3x8x8x16xf32, #tpu.memory_space<vmem>>, vector<1x1x8x8x16xf32>,
    return
  }
  func.func @transform_0(%arg0: i32, %arg1: i32) -> (i32, i32, i32) {
    %c0_i32 = arith.constant 0 : i32
    %c0_i32_0 = arith.constant 0 : i32
    return %arg0, %arg1, %c0_i32 : i32, i32, i32
  }
  func.func @transform_1(%arg0: i32, %arg1: i32) -> (i32, i32, i32, i32) {
    %c0_i32 = arith.constant 0 : i32
    %c0_i32_0 = arith.constant 0 : i32
    %c0_i32_1 = arith.constant 0 : i32
    %c0_i32_2 = arith.constant 0 : i32
    %c0_i32_3 = arith.constant 0 : i32
    return %c0_i32, %c0_i32_0, %c0_i32_1, %c0_i32_2 : i32, i32, i32, i32
  }
  func.func @transform_2(%arg0: i32, %arg1: i32) -> (i32, i32, i32) {
    %c0_i32 = arith.constant 0 : i32
    %c0_i32_0 = arith.constant 0 : i32
    %c0_i32_1 = arith.constant 0 : i32
    %c0_i32_2 = arith.constant 0 : i32
    return %c0_i32, %c0_i32_0, %c0_i32_1 : i32, i32, i32
  }
  func.func @transform_3(%arg0: i32, %arg1: i32) -> (i32, i32, i32, i32, i32) {
    %c0_i32 = arith.constant 0 : i32
    %c0_i32_0 = arith.constant 0 : i32
    %c0_i32_1 = arith.constant 0 : i32
    %c0_i32_2 = arith.constant 0 : i32
    return %arg0, %c0_i32, %arg1, %c0_i32_0, %c0_i32_1 : i32, i32, i32, i32, i32
  }
}

</mosaic_0001>

<bundles_post_ra>
// kernel: tpu_custom_call.1
= control target key start
LH: loop header
LB: loop body
LE: loop exit
PB: predicated region body
PF: predicated region fallthrough
CT: control target
= control target key end

     0   :  { %8 = vsyncpa [#allocation3], 0  ;;  %s6395_s0 = inlined_call_operand.vmem [shape: f32[2,64,4], index: 0, kind: input, shape index: {}]   ;;  %s6396_s1 = inlined_call_operand.vmem [shape: f32[3,3,4,8], index: 1, kind: input, shape index: {}]   ;;  %s6397_s2 = inlined_call_operand.vmem [shape: f32[3,16,8], index: 2, kind: input, shape index: {}]   ;;  %s6398_s3 = inlined_call_operand.hbm [shape: f32[2,3,8,8,16], index: 3, kind: output, shape index: {}]  }
   0x1   :  { %10 = vsyncpa [#allocation3 + $0x1], 0  ;;  %s5793_s12 = smov 0   ;;  %s5795_s13 = smov 0  }
   0x2   :  { %s5797_s14 = smov 0   ;;  %s5799_s15 = smov 0  }
   0x3   :  { %s5801_s16 = smov 0   ;;  %s5803_s17 = smov 0  }
   0x4 LB: > { %s4973_s18 = sadd.s32 4294967295, %s5768_s17   ;;  %s4974_s19 = sadd.s32 4294967294, %s5768_s17   ;;  %s5768_s17 = sphi %s5803_s17, %s16_s17   ;;  %s5764_s16 = sphi %s5801_s16, %s6405_s16   ;;  %s5760_s15 = sphi %s5799_s15, %s6404_s15   ;;  %s5756_s14 = sphi %s5797_s14, %s6403_s14   ;;  %s5752_s13 = sphi %s5795_s13, %s6402_s13   ;;  %s5748_s12 = sphi %s5793_s12, %s6401_s12  }
   0x5   : > { %s28_s20 = sadd.s32 1, %s5764_s16  ;;  %s107_s21 = sadd.s32 1, %s5756_s14 }
   0x6   : > { %p30_p0 = scmp.ge.s32.totalorder %s28_s20, 2  ;;  %p117_p1 = scmp.ne.s32.totalorder %s5756_s14, %s5752_s13 }
   0x7   : > { %p118_p2 = scmp.eq.s32.totalorder %s4973_s18, 1  ;;  %p123_p3 = scmp.ne.s32.totalorder %s5752_s13, %s5748_s12 }
   0x8   : > { %s6407_s20 = smov (%p30_p0, %s28_s20), 0  ;;  %p124_p5 = scmp.eq.s32.totalorder %s4974_s19, 1 }
   0x9   : > { %p5833_p4 = por %p118_p2, %p117_p1  ;;  %s102_s23 = ssub.s32 %s5764_s16, %s6407_s20 }
   0xa   : > { %p4977_p6 = scmp.ge.s32.totalorder %s5768_s17, 1  ;;  %p105_p7 = scmp.eq.s32.totalorder %s102_s23, 0 }
   0xb   : > { %p5840_p8 = por %p124_p5, %p123_p3  ;;  %p161_p9 = scmp.lt.s32.totalorder %s5768_s17, 3 }
   0xc   : > { %s5846_s25 = scalar_select %p105_p7, %s5756_s14, %s107_s21  }
   0xd   : > { %p162_p10 = pnand %p4977_p6, %p161_p9 }
   0xe   : > { %p190_p11 = scmp.lt.s32.totalorder (!%p162_p10), %s5760_s15, 1  ;;  %s186_s9 = sand.u32 (!%p162_p10), 1, %s5752_s13  }
   0xf   : > { %165 = sbr.rel (%p162_p10) target bundleno = 2258 (0x8d2), region = 32 }
  0x10   : > { %s5632_s10 = smul.u32 (!%p162_p10), 192, %s186_s9 }
  0x12   : > { %s6092_s11 = scalar_lea.vmem (!%p162_p10), [#allocation2], %s5632_s10  ;;  %s5770_s10 = smov (!%p162_p10), [#allocation2]  }
  0x13   : > { %s5696_s18 = sshll.u32 (!%p162_p10), %s5770_s10, 4  ;;  %s5697_s18 = int_to_ptr.vmem [resolvable:$false] %s5696_s18 }
  0x14   : > { %vm234_vm0 = vcmask 1043456   ;;  %v4989_v0 = vld [vmem:[%s6396_s1 + $0xc] sm:$0xf]  ;;  %v208_v1 = vld [vmem:[%s6396_s1] sm:$0xf]  ;;  %s191_s30 = scalar_select %p190_p11, %s5760_s15, 1 }
  0x15   : > { %5376 = vmatprep.subr.msk.mxu1 %vm234_vm0, %v4989_v0  ;;  %5362 = vmatprep.subr.msk.mxu0 %vm234_vm0, %v208_v1  ;;  %vm209_vm1 = vcmask 31744   ;;  %v5914_v10 = vld [vmem:[%s6397_s2 + $0x18] sm:$0xff]  ;;  %vm714_vm2 = vcmask 64512   ;;  %v5919_v11 = vld [vmem:[%s6397_s2 + $0x10] sm:$0xff]  ;;  %v5936_v22 = vld [vmem:[%s6397_s2 + $0x8] sm:$0xff]  ;;  %vm1753_vm3 = vcmask 130048  }
  0x16   : > { %5377 = vmatpush3.msk.msra.mxu1 %vm234_vm0, %v4989_v0  ;;  %5363 = vmatpush3.msk.msra.mxu0 %vm234_vm0, %v208_v1  ;;  %s5190_s4 = sshll.u32 %s191_s30, 6  ;;  %v5021_v15 = vld [vmem:[%s6396_s1 + $0x18] sm:$0xf]  ;;  %v5945_v26 = vld [vmem:[%s6397_s2] sm:$0xff]  ;;  %v5989_v47 = vld [vmem:[%s6397_s2 + $0x28] sm:$0xff]  ;;  %s5633_s30 = smul.u32 3072, %s5760_s15 }
  0x17   : > { %s197_s7 = scalar_lea.vmem %s6395_s0, %s5190_s4  ;;  %5390 = vmatprep.subr.msk.mxu0 %vm714_vm2, %v5914_v10  ;;  %5406 = vmatprep.subr.msk.mxu1 %vm714_vm2, %v5936_v22  ;;  %v5994_v48 = vld [vmem:[%s6397_s2 + $0x20] sm:$0xff]  ;;  %v5053_v57 = vld [vmem:[%s6396_s1 + $0x10] sm:$0xf]  ;;  %s4894_s4 = sshll.u32 %s6092_s11, 4  ;;  %s6342_s4 = int_to_ptr.vmem [resolvable:$true] %s4894_s4 }
  0x18   : > { %v5863_v2 = vld [vmem:[%s197_s7] sm:$0xff]  ;;  %v5865_v3 = vld [vmem:[%s197_s7 + $0x8] sm:$0xff]  ;;  %v5867_v4 = vld [vmem:[%s197_s7 + $0x10] sm:$0xff]  ;;  %s6350_s15 = scalar_lea.sflag [#allocation3], %s186_s9  ;;  %s5692_s8 = scalar_lea.vmem %s6342_s4, 3072 }
  0x19   : > { %5378 = vmatprep.mubr.msk.f32.mxu1 %vm209_vm1, %v5863_v2  ;;  %5364 = vmatprep.mubr.msk.f32.mxu0 %vm209_vm1, %v5863_v2  ;;  %v5879_v5 = vld [vmem:[%s197_s7 + $0x18] sm:$0xff]  ;;  %v5883_v6 = vld [vmem:[%s197_s7 + $0x20] sm:$0xff]  ;;  %v5891_v7 = vld [vmem:[%s197_s7 + $0x28] sm:$0xff]  ;;  %p5693_p12 = scmp.ne.s32.totalorder %s6342_s4, %s5692_s8  ;;  %s5698_s19 = scalar_lea.vmem %s5697_s18, 6144 }
  0x1a   : > { %5379 = vmatmul.mubr.msk.f32.vlgmr.msra.gmra.mxu1 %vm209_vm1, %v5865_v3  ;;  %5365 = vmatmul.mubr.msk.f32.vlgmr.msra.gmra.mxu0 %vm209_vm1, %v5865_v3  ;;  %v5895_v8 = vld [vmem:[%s197_s7 + $0x30] sm:$0xff]  ;;  %v5903_v9 = vld [vmem:[%s197_s7 + $0x38] sm:$0xff]  ;;  %s6340_s7 = scalar_lea.hbm %s6398_s3, %s5633_s30  ;;  %p5699_p1 = scmp.lt.s32.totalorder %s6342_s4, %s5697_s18 }
  0x1b   : > { %5381 = vmatprep.mubr.msk.f32.mxu1 %vm209_vm1, %v5867_v4  ;;  %5367 = vmatprep.mubr.msk.f32.mxu0 %vm209_vm1, %v5867_v4  ;;  %p5694_p13 = pnand %p5693_p12, %p5833_p4  ;;  %p5700_p2 = scmp.lt.s32.totalorder %s5698_s19, %s5692_s8 }
  0x1c   : > { %5391 = vmatpush3.xpose.msk.msra.mxu0 %vm714_vm2, %v5914_v10  ;;  %5407 = vmatpush3.xpose.msk.msra.mxu1 %vm714_vm2, %v5936_v22 }
  0x1d   : > { %5392 = vmatprep.subr.msk.mxu0 %vm714_vm2, %v5919_v11  ;;  %5408 = vmatprep.subr.msk.mxu1 %vm714_vm2, %v5945_v26  ;;  %p5695_p0 = pneg %p5694_p13  ;;  %p5701_p3 = por %p5700_p2, %p5699_p1 }
  0x1e   : > { %5382 = vmatmul.mubr.msk.f32.gmra.mxu1 %vm209_vm1, %v5879_v5  ;;  %5368 = vmatmul.mubr.msk.f32.gmra.mxu0 %vm209_vm1, %v5879_v5 }
  0x1f   : > { %5384 = vmatprep.mubr.msk.f32.mxu1 %vm209_vm1, %v5883_v6  ;;  %5370 = vmatprep.mubr.msk.f32.mxu0 %vm209_vm1, %v5883_v6  ;;  %p5702_p5 = pnand %p5701_p3, %p5695_p0 }
  0x20   : > { %5393 = vmatpush3.xpose.msk.msra.mxu0 %vm714_vm2, %v5919_v11  ;;  %5409 = vmatpush3.xpose.msk.msra.mxu1 %vm714_vm2, %v5945_v26 }
  0x21   : > { %5422 = vmatprep.subr.msk.mxu0 %vm234_vm0, %v5021_v15  ;;  %5436 = vmatprep.subr.msk.mxu1 %vm714_vm2, %v5989_v47 }
  0x22   : > { %5385 = vmatmul.mubr.msk.f32.gmra.mxu1 %vm209_vm1, %v5891_v7  ;;  %5371 = vmatmul.mubr.msk.f32.gmra.mxu0 %vm209_vm1, %v5891_v7 }
  0x23   : > { %5387 = vmatprep.mubr.msk.f32.mxu1 %vm209_vm1, %v5895_v8  ;;  %5373 = vmatprep.mubr.msk.f32.mxu0 %vm209_vm1, %v5895_v8 }
  0x26   : > { %5388 = vmatmul.mubr.msk.f32.gmra.mxu1 %vm209_vm1, %v5903_v9  ;;  %5374 = vmatmul.mubr.msk.f32.gmra.mxu0 %vm209_vm1, %v5903_v9 }
  0xda   : > { %v5380_v12 = vpop.f32.mrf.mxu1  ;;  %v5366_v13 = vpop.f32.mrf.mxu0 }
  0xdc   : > { %v416_v14 = vpop.f32.mrf.mxu1  ;;  %v304_v17 = vpop.f32.mrf.mxu0 }
  0xdd   : > { %458 = vxpose.xlu0.b32.start.end [1/1] (short) (narrow) %v416_v14, 8 }
  0xde   : > { %v5383_v16 = vpop.f32.mrf.mxu1  ;;  %v5369_v20 = vpop.f32.mrf.mxu0 }
  0xe0   : > { %v426_v18 = vpop.f32.mrf.mxu1  ;;  %v314_v24 = vpop.f32.mrf.mxu0 }
  0xe1   : > { %490 = vxpose.xlu0.b32.start.end [1/1] (short) (narrow) %v5380_v12, 8  ;;  %522 = vxpose.xlu1.b32.start.end [1/1] (short) (narrow) %v426_v18, 8  ;;  %v5043_v12 = vld [vmem:[%s6396_s1 + $0x4] sm:$0xf] }
  0xe2   : > { %v5386_v19 = vpop.f32.mrf.mxu1  ;;  %v5372_v27 = vpop.f32.mrf.mxu0 }
  0xe4   : > { %v436_v21 = vpop.f32.mrf.mxu1  ;;  %v324_v28 = vpop.f32.mrf.mxu0 }
  0xe5   : > { %554 = vxpose.xlu1.b32.start.end [1/1] (short) (narrow) %v5383_v16, 8  ;;  %586 = vxpose.xlu0.b32.start.end [1/1] (short) (narrow) %v436_v21, 8 }
  0xe6   : > { %v5389_v23 = vpop.f32.mrf.mxu1  ;;  %v5375_v29 = vpop.f32.mrf.mxu0 }
  0xe8   : > { %v446_v25 = vpop.f32.mrf.mxu1  ;;  %v334_v30 = vpop.f32.mrf.mxu0 }
  0xe9   : > { %618 = vxpose.xlu1.b32.start.end [1/1] (short) (narrow) %v5386_v19, 8  ;;  %650 = vxpose.xlu0.b32.start.end [1/1] (short) (narrow) %v446_v25, 8 }
  0xed   : > { %682 = vxpose.xlu1.b32.start.end [1/1] (short) (narrow) %v5389_v23, 8  ;;  %850 = vxpose.xlu0.b32.start.end [1/1] (short) (narrow) %v304_v17, 8 }
  0xf1   : > { %882 = vxpose.xlu1.b32.start.end [1/1] (short) (narrow) %v5366_v13, 8  ;;  %914 = vxpose.xlu0.b32.start.end [1/1] (short) (narrow) %v314_v24, 8 }
  0xf5   : > { %946 = vxpose.xlu1.b32.start.end [1/1] (short) (narrow) %v5369_v20, 8  ;;  %978 = vxpose.xlu0.b32.start.end [1/1] (short) (narrow) %v324_v28, 8 }
  0xf9   : > { %1010 = vxpose.xlu1.b32.start.end [1/1] (short) (narrow) %v5372_v27, 8  ;;  %1042 = vxpose.xlu0.b32.start.end [1/1] (short) (narrow) %v334_v30, 8 }
  0xfd   : > { %1074 = vxpose.xlu1.b32.start.end [1/1] (short) (narrow) %v5375_v29, 8 }
 0x159   : > { %v474_v31 = vpop.trf.xlu0 }
 0x15a   : > { %5394 = vmatprep.mubr.msk.f32.mxu0 %vm714_vm2, %v474_v31 }
 0x15d   : > { %v506_v32 = vpop.trf.xlu0  ;;  %v538_v33 = vpop.trf.xlu1 }
 0x15e   : > { %5395 = vmatmul.mubr.msk.f32.vlgmr.msra.gmra.mxu0 %vm714_vm2, %v506_v32 }
 0x15f   : > { %5423 = vmatpush3.msk.msra.mxu0 %vm234_vm0, %v5021_v15  ;;  %5397 = vmatprep.mubr.msk.f32.mxu0 %vm714_vm2, %v538_v33 }
 0x160   : > { %5452 = vmatprep.subr.msk.mxu0 %vm234_vm0, %v5043_v12 }
 0x161   : > { %v570_v34 = vpop.trf.xlu1  ;;  %v602_v35 = vpop.trf.xlu0 }
 0x162   : > { %5398 = vmatmul.mubr.msk.f32.gmra.mxu0 %vm714_vm2, %v570_v34 }
 0x163   : > { %5400 = vmatprep.mubr.msk.f32.mxu0 %vm714_vm2, %v602_v35 }
 0x165   : > { %v634_v36 = vpop.trf.xlu1  ;;  %v666_v37 = vpop.trf.xlu0 }
 0x166   : > { %5401 = vmatmul.mubr.msk.f32.gmra.mxu0 %vm714_vm2, %v634_v36 }
 0x167   : > { %5403 = vmatprep.mubr.msk.f32.mxu0 %vm714_vm2, %v666_v37 }
 0x169   : > { %v698_v38 = vpop.trf.xlu1  ;;  %v866_v39 = vpop.trf.xlu0 }
 0x16a   : > { %5404 = vmatmul.mubr.msk.f32.gmra.mxu0 %vm714_vm2, %v698_v38  ;;  %5410 = vmatprep.mubr.msk.f32.mxu1 %vm714_vm2, %v866_v39 }
 0x16b   : > { %5424 = vmatprep.mubr.msk.f32.mxu0 %vm209_vm1, %v5863_v2 }
 0x16d   : > { %v898_v40 = vpop.trf.xlu1  ;;  %v930_v41 = vpop.trf.xlu0 }
 0x16e   : > { %5411 = vmatmul.mubr.msk.f32.vlgmr.msra.gmra.mxu1 %vm714_vm2, %v898_v40  ;;  %5425 = vmatmul.mubr.msk.f32.vlgmr.msra.gmra.mxu0 %vm209_vm1, %v5865_v3 }
 0x16f   : > { %5427 = vmatprep.mubr.msk.f32.mxu0 %vm209_vm1, %v5867_v4  ;;  %5413 = vmatprep.mubr.msk.f32.mxu1 %vm714_vm2, %v930_v41 }
 0x170   : > { %5437 = vmatpush3.xpose.msk.msra.mxu1 %vm714_vm2, %v5989_v47  ;;  %5453 = vmatpush3.msk.msra.mxu0 %vm234_vm0, %v5043_v12 }
 0x171   : > { %v962_v42 = vpop.trf.xlu1  ;;  %v994_v43 = vpop.trf.xlu0  ;;  %5438 = vmatprep.subr.msk.mxu1 %vm714_vm2, %v5994_v48  ;;  %5480 = vmatprep.subr.msk.mxu0 %vm714_vm2, %v5914_v10 }
 0x172   : > { %5414 = vmatmul.mubr.msk.f32.gmra.mxu1 %vm714_vm2, %v962_v42  ;;  %5428 = vmatmul.mubr.msk.f32.gmra.mxu0 %vm209_vm1, %v5879_v5 }
 0x173   : > { %5430 = vmatprep.mubr.msk.f32.mxu0 %vm209_vm1, %v5883_v6  ;;  %5416 = vmatprep.mubr.msk.f32.mxu1 %vm714_vm2, %v994_v43 }
 0x174   : > { %5439 = vmatpush3.xpose.msk.msra.mxu1 %vm714_vm2, %v5994_v48 }
 0x175   : > { %v1026_v44 = vpop.trf.xlu1  ;;  %v1058_v45 = vpop.trf.xlu0  ;;  %5466 = vmatprep.subr.msk.mxu1 %vm234_vm0, %v5053_v57 }
 0x176   : > { %5417 = vmatmul.mubr.msk.f32.gmra.mxu1 %vm714_vm2, %v1026_v44  ;;  %5431 = vmatmul.mubr.msk.f32.gmra.mxu0 %vm209_vm1, %v5891_v7 }
 0x177   : > { %5433 = vmatprep.mubr.msk.f32.mxu0 %vm209_vm1, %v5895_v8  ;;  %5419 = vmatprep.mubr.msk.f32.mxu1 %vm714_vm2, %v1058_v45 }
 0x179   : > { %v1090_v46 = vpop.trf.xlu1 }
 0x17a   : > { %5420 = vmatmul.mubr.msk.f32.gmra.mxu1 %vm714_vm2, %v1090_v46  ;;  %5434 = vmatmul.mubr.msk.f32.gmra.mxu0 %vm209_vm1, %v5903_v9 }
 0x17b   : > { %5454 = vmatprep.mubr.msk.f32.mxu0 %vm209_vm1, %v5863_v2 }
 0x17e   : > { %5455 = vmatmul.mubr.msk.f32.vlgmr.msra.gmra.mxu0 %vm209_vm1, %v5865_v3 }
 0x17f   : > { %5457 = vmatprep.mubr.msk.f32.mxu0 %vm209_vm1, %v5867_v4  ;;  %5481 = vmatpush3.xpose.msk.msra.mxu0 %vm714_vm2, %v5914_v10 }
 0x180   : > { %5482 = vmatprep.subr.msk.mxu0 %vm714_vm2, %v5919_v11 }
 0x182   : > { %5458 = vmatmul.mubr.msk.f32.gmra.mxu0 %vm209_vm1, %v5879_v5 }
 0x183   : > { %5460 = vmatprep.mubr.msk.f32.mxu0 %vm209_vm1, %v5883_v6  ;;  %5483 = vmatpush3.xpose.msk.msra.mxu0 %vm714_vm2, %v5919_v11 }
 0x186   : > { %5461 = vmatmul.mubr.msk.f32.gmra.mxu0 %vm209_vm1, %v5891_v7 }
 0x187   : > { %5463 = vmatprep.mubr.msk.f32.mxu0 %vm209_vm1, %v5895_v8 }
 0x18a   : > { %5464 = vmatmul.mubr.msk.f32.gmra.mxu0 %vm209_vm1, %v5903_v9 }
 0x21e   : > { %v6004_v49 = vpop.f32.mrf.mxu0 }
 0x220   : > { %v6006_v50 = vpop.f32.mrf.mxu0 }
 0x222   : > { %v6008_v51 = vpop.f32.mrf.mxu0 }
 0x224   : > { %v6010_v52 = vpop.f32.mrf.mxu0 }
 0x226   : > { %v6012_v53 = vpop.f32.mrf.mxu0 }
 0x228   : > { %v6014_v54 = vpop.f32.mrf.mxu0 }
 0x22a   : > { %v6016_v55 = vpop.f32.mrf.mxu0 }
 0x22c   : > { %v6018_v56 = vpop.f32.mrf.mxu0 }
 0x22e   : > { %v5426_v58 = vpop.f32.mrf.mxu0  ;;  %v5412_v21 = vpop.f32.mrf.mxu1 }
 0x22f   : > { %1386 = vxpose.xlu1.b32.start.end [1/1] (short) (narrow) %v5426_v58, 8  ;;  %v1208_v31 = vadd.f32 %v5412_v21, %v6004_v49 }
 0x230   : > { %v1312_v59 = vpop.f32.mrf.mxu0  ;;  %v1202_v23 = vpop.f32.mrf.mxu1 }
 0x231   : > { %1354 = vxpose.xlu0.b32.start.end [1/1] (short) (narrow) %v1312_v59, 8  ;;  %v1203_v33 = vadd.f32 %v1202_v23, %v6006_v50  ;;  %v5085_v59 = vld [vmem:[%s6396_s1 + $0x1c] sm:$0xf] }
 0x232   : > { %v5429_v60 = vpop.f32.mrf.mxu0  ;;  %v5415_v24 = vpop.f32.mrf.mxu1  ;;  %5512 = vmatprep.subr.msk.mxu0 %vm234_vm0, %v5085_v59 }
 0x233   : > { %1450 = vxpose.xlu1.b32.start.end [1/1] (short) (narrow) %v5429_v60, 8  ;;  %v1218_v36 = vadd.f32 %v5415_v24, %v6008_v51 }
 0x234   : > { %v1322_v61 = vpop.f32.mrf.mxu0  ;;  %v1212_v25 = vpop.f32.mrf.mxu1 }
 0x235   : > { %1418 = vxpose.xlu0.b32.start.end [1/1] (short) (narrow) %v1322_v61, 8  ;;  %v1213_v39 = vadd.f32 %v1212_v25, %v6010_v52 }
 0x236   : > { %v5432_v62 = vpop.f32.mrf.mxu0  ;;  %v5418_v27 = vpop.f32.mrf.mxu1 }
 0x237   : > { %1514 = vxpose.xlu1.b32.start.end [1/1] (short) (narrow) %v5432_v62, 8  ;;  %v1228_v42 = vadd.f32 %v5418_v27, %v6012_v53 }
 0x238   : > { %v1332_v63 = vpop.f32.mrf.mxu0  ;;  %v1222_v28 = vpop.f32.mrf.mxu1 }
 0x239   : > { %1482 = vxpose.xlu0.b32.start.end [1/1] (short) (narrow) %v1332_v63, 8  ;;  %v1223_v45 = vadd.f32 %v1222_v28, %v6014_v54 }
 0x23a   : > { %v5435_v0 = vpop.f32.mrf.mxu0  ;;  %v5421_v29 = vpop.f32.mrf.mxu1 }
 0x23b   : > { %1578 = vxpose.xlu1.b32.start.end [1/1] (short) (narrow) %v5435_v0, 8  ;;  %v1238_v50 = vadd.f32 %v5421_v29, %v6016_v55 }
 0x23c   : > { %v1342_v1 = vpop.f32.mrf.mxu0  ;;  %v1232_v30 = vpop.f32.mrf.mxu1 }
 0x23d   : > { %1546 = vxpose.xlu0.b32.start.end [1/1] (short) (narrow) %v1342_v1, 8  ;;  %v1233_v53 = vadd.f32 %v1232_v30, %v6018_v56 }
 0x23e   : > { %v5456_v61 = vpop.f32.mrf.mxu0 }
 0x240   : > { %v1865_v62 = vpop.f32.mrf.mxu0 }
 0x242   : > { %v5459_v1 = vpop.f32.mrf.mxu0 }
 0x2ab   : > { %v1402_v13 = vpop.trf.xlu1 }
 0x2ad   : > { %v1370_v14 = vpop.trf.xlu0 }
 0x2ae   : > { %5440 = vmatprep.mubr.msk.f32.mxu1 %vm714_vm2, %v1370_v14  ;;  %v1875_v14 = vpop.f32.mrf.mxu0 }
 0x2af   : > { %5441 = vmatmul.mubr.msk.f32.vlgmr.msra.gmra.mxu1 %vm714_vm2, %v1402_v13  ;;  %v1466_v15 = vpop.trf.xlu1 }
 0x2b0   : > { %5467 = vmatpush3.msk.msra.mxu1 %vm234_vm0, %v5053_v57 }
 0x2b1   : > { %v1434_v16 = vpop.trf.xlu0  ;;  %5496 = vmatprep.subr.msk.mxu1 %vm714_vm2, %v5936_v22 }
 0x2b2   : > { %5443 = vmatprep.mubr.msk.f32.mxu1 %vm714_vm2, %v1434_v16  ;;  %v5462_v16 = vpop.f32.mrf.mxu0 }
 0x2b3   : > { %5444 = vmatmul.mubr.msk.f32.gmra.mxu1 %vm714_vm2, %v1466_v15  ;;  %v1530_v17 = vpop.trf.xlu1 }
 0x2b5   : > { %v1498_v18 = vpop.trf.xlu0 }
 0x2b6   : > { %5446 = vmatprep.mubr.msk.f32.mxu1 %vm714_vm2, %v1498_v18 }
 0x2b7   : > { %5447 = vmatmul.mubr.msk.f32.gmra.mxu1 %vm714_vm2, %v1530_v17  ;;  %v1594_v19 = vpop.trf.xlu1  ;;  %v1885_v17 = vpop.f32.mrf.mxu0 }
 0x2b9   : > { %v1562_v20 = vpop.trf.xlu0  ;;  %v5465_v18 = vpop.f32.mrf.mxu0 }
 0x2ba   : > { %5449 = vmatprep.mubr.msk.f32.mxu1 %vm714_vm2, %v1562_v20 }
 0x2bb   : > { %5450 = vmatmul.mubr.msk.f32.gmra.mxu1 %vm714_vm2, %v1594_v19  ;;  %v1895_v19 = vpop.f32.mrf.mxu0 }
 0x2bc   : > { %5468 = vmatprep.mubr.msk.f32.mxu1 %vm209_vm1, %v5863_v2 }
 0x2bf   : > { %5469 = vmatmul.mubr.msk.f32.vlgmr.msra.gmra.mxu1 %vm209_vm1, %v5865_v3 }
 0x2c0   : > { %5471 = vmatprep.mubr.msk.f32.mxu1 %vm209_vm1, %v5867_v4  ;;  %5497 = vmatpush3.xpose.msk.msra.mxu1 %vm714_vm2, %v5936_v22 }
 0x2c1   : > { %5498 = vmatprep.subr.msk.mxu1 %vm714_vm2, %v5945_v26 }
 0x2c3   : > { %5472 = vmatmul.mubr.msk.f32.gmra.mxu1 %vm209_vm1, %v5879_v5 }
 0x2c4   : > { %5474 = vmatprep.mubr.msk.f32.mxu1 %vm209_vm1, %v5883_v6  ;;  %5499 = vmatpush3.xpose.msk.msra.mxu1 %vm714_vm2, %v5945_v26 }
 0x2c5   : > { %5526 = vmatprep.subr.msk.mxu1 %vm714_vm2, %v5989_v47 }
 0x2c7   : > { %5475 = vmatmul.mubr.msk.f32.gmra.mxu1 %vm209_vm1, %v5891_v7 }
 0x2c8   : > { %5477 = vmatprep.mubr.msk.f32.mxu1 %vm209_vm1, %v5895_v8 }
 0x2cb   : > { %5478 = vmatmul.mubr.msk.f32.gmra.mxu1 %vm209_vm1, %v5903_v9 }
 0x36f   : > { %v5442_v32 = vpop.f32.mrf.mxu1 }
 0x370   : > { %v1746_v34 = vadd.f32 %v5442_v32, %v1208_v31 }
 0x371   : > { %v1706_v35 = vpop.f32.mrf.mxu1 }
 0x372   : > { %1755 = vst.msk [vmem:[%s6092_s11 + $0x8] sm:$0xff] %vm1753_vm3, %v1746_v34  ;;  %v1745_v37 = vadd.f32 %v1706_v35, %v1203_v33 }
 0x373   : > { %v5445_v38 = vpop.f32.mrf.mxu1 }
 0x374   : > { %1754 = vst.msk [vmem:[%s6092_s11] sm:$0xff] %vm1753_vm3, %v1745_v37  ;;  %v1748_v40 = vadd.f32 %v5445_v38, %v1218_v36 }
 0x375   : > { %v1716_v41 = vpop.f32.mrf.mxu1 }
 0x376   : > { %1757 = vst.msk [vmem:[%s6092_s11 + $0x18] sm:$0xff] %vm1753_vm3, %v1748_v40  ;;  %v1747_v43 = vadd.f32 %v1716_v41, %v1213_v39 }
 0x377   : > { %v5448_v44 = vpop.f32.mrf.mxu1 }
 0x378   : > { %1756 = vst.msk [vmem:[%s6092_s11 + $0x10] sm:$0xff] %vm1753_vm3, %v1747_v43  ;;  %v1750_v46 = vadd.f32 %v5448_v44, %v1228_v42 }
 0x379   : > { %v1726_v49 = vpop.f32.mrf.mxu1 }
 0x37a   : > { %1759 = vst.msk [vmem:[%s6092_s11 + $0x28] sm:$0xff] %vm1753_vm3, %v1750_v46  ;;  %v1749_v51 = vadd.f32 %v1726_v49, %v1223_v45  ;;  %v5125_v46 = vld [vmem:[%s6396_s1 + $0x14] sm:$0xf] }
 0x37b   : > { %v5451_v52 = vpop.f32.mrf.mxu1 }
 0x37c   : > { %1758 = vst.msk [vmem:[%s6092_s11 + $0x20] sm:$0xff] %vm1753_vm3, %v1749_v51  ;;  %v1752_v57 = vadd.f32 %v5451_v52, %v1238_v50 }
 0x37d   : > { %v1736_v58 = vpop.f32.mrf.mxu1 }
 0x37e   : > { %1761 = vst.msk [vmem:[%s6092_s11 + $0x38] sm:$0xff] %vm1753_vm3, %v1752_v57  ;;  %v1751_v54 = vadd.f32 %v1736_v58, %v1233_v53 }
 0x37f   : > { %v5470_v60 = vpop.f32.mrf.mxu1 }
 0x380   : > { %1760 = vst.msk [vmem:[%s6092_s11 + $0x30] sm:$0xff] %vm1753_vm3, %v1751_v54  ;;  %2050 = vxpose.xlu1.b32.start.end [1/1] (short) (narrow) %v5470_v60, 8 }
 0x381   : > { %v1977_v55 = vpop.f32.mrf.mxu1 }
 0x382   : > { %2018 = vxpose.xlu0.b32.start.end [1/1] (short) (narrow) %v1977_v55, 8 }
 0x383   : > { %v5473_v56 = vpop.f32.mrf.mxu1 }
 0x384   : > { %2114 = vxpose.xlu1.b32.start.end [1/1] (short) (narrow) %v5473_v56, 8 }
 0x385   : > { %v1987_v63 = vpop.f32.mrf.mxu1 }
 0x386   : > { %2082 = vxpose.xlu0.b32.start.end [1/1] (short) (narrow) %v1987_v63, 8 }
 0x387   : > { %v5476_v0 = vpop.f32.mrf.mxu1 }
 0x388   : > { %2178 = vxpose.xlu1.b32.start.end [1/1] (short) (narrow) %v5476_v0, 8 }
 0x389   : > { %v1997_v12 = vpop.f32.mrf.mxu1 }
 0x38a   : > { %2146 = vxpose.xlu0.b32.start.end [1/1] (short) (narrow) %v1997_v12, 8 }
 0x38b   : > { %v5479_v13 = vpop.f32.mrf.mxu1 }
 0x38c   : > { %2242 = vxpose.xlu1.b32.start.end [1/1] (short) (narrow) %v5479_v13, 8 }
 0x38d   : > { %v2007_v15 = vpop.f32.mrf.mxu1 }
 0x38e   : > { %2210 = vxpose.xlu0.b32.start.end [1/1] (short) (narrow) %v2007_v15, 8 }
 0x390   : > { %2441 = vxpose.xlu1.b32.start.end [1/1] (short) (narrow) %v5456_v61, 8 }
 0x392   : > { %2409 = vxpose.xlu0.b32.start.end [1/1] (short) (narrow) %v1865_v62, 8 }
 0x394   : > { %2505 = vxpose.xlu1.b32.start.end [1/1] (short) (narrow) %v5459_v1, 8 }
 0x396   : > { %2473 = vxpose.xlu0.b32.start.end [1/1] (short) (narrow) %v1875_v14, 8 }
 0x398   : > { %2569 = vxpose.xlu1.b32.start.end [1/1] (short) (narrow) %v5462_v16, 8 }
 0x39a   : > { %2537 = vxpose.xlu0.b32.start.end [1/1] (short) (narrow) %v1885_v17, 8 }
 0x39c   : > { %2633 = vxpose.xlu1.b32.start.end [1/1] (short) (narrow) %v5465_v18, 8 }
 0x39e   : > { %2601 = vxpose.xlu0.b32.start.end [1/1] (short) (narrow) %v1895_v19, 8 }
 0x3fc   : > { %v2066_v20 = vpop.trf.xlu1 }
 0x3fe   : > { %v2034_v21 = vpop.trf.xlu0 }
 0x3ff   : > { %5484 = vmatprep.mubr.msk.f32.mxu0 %vm714_vm2, %v2034_v21 }
 0x400   : > { %5485 = vmatmul.mubr.msk.f32.vlgmr.msra.gmra.mxu0 %vm714_vm2, %v2066_v20  ;;  %v2130_v23 = vpop.trf.xlu1 }
 0x401   : > { %5513 = vmatpush3.msk.msra.mxu0 %vm234_vm0, %v5085_v59  ;;  %v5115_v59 = vld [vmem:[%s6396_s1 + $0x8] sm:$0xf] }
 0x402   : > { %v2098_v24 = vpop.trf.xlu0  ;;  %5542 = vmatprep.subr.msk.mxu0 %vm234_vm0, %v5115_v59 }
 0x403   : > { %5487 = vmatprep.mubr.msk.f32.mxu0 %vm714_vm2, %v2098_v24 }
 0x404   : > { %5488 = vmatmul.mubr.msk.f32.gmra.mxu0 %vm714_vm2, %v2130_v23  ;;  %v2194_v25 = vpop.trf.xlu1 }
 0x406   : > { %v2162_v27 = vpop.trf.xlu0 }
 0x407   : > { %5490 = vmatprep.mubr.msk.f32.mxu0 %vm714_vm2, %v2162_v27 }
 0x408   : > { %5491 = vmatmul.mubr.msk.f32.gmra.mxu0 %vm714_vm2, %v2194_v25  ;;  %v2258_v28 = vpop.trf.xlu1 }
 0x40a   : > { %v2226_v29 = vpop.trf.xlu0 }
 0x40b   : > { %5493 = vmatprep.mubr.msk.f32.mxu0 %vm714_vm2, %v2226_v29 }
 0x40c   : > { %5494 = vmatmul.mubr.msk.f32.gmra.mxu0 %vm714_vm2, %v2258_v28  ;;  %v2457_v30 = vpop.trf.xlu1 }
 0x40d   : > { %5514 = vmatprep.mubr.msk.f32.mxu0 %vm209_vm1, %v5863_v2 }
 0x40e   : > { %v2425_v31 = vpop.trf.xlu0 }
 0x40f   : > { %5500 = vmatprep.mubr.msk.f32.mxu1 %vm714_vm2, %v2425_v31 }
 0x410   : > { %5501 = vmatmul.mubr.msk.f32.vlgmr.msra.gmra.mxu1 %vm714_vm2, %v2457_v30  ;;  %5515 = vmatmul.mubr.msk.f32.vlgmr.msra.gmra.mxu0 %vm209_vm1, %v5865_v3  ;;  %v2521_v32 = vpop.trf.xlu1 }
 0x411   : > { %5517 = vmatprep.mubr.msk.f32.mxu0 %vm209_vm1, %v5867_v4  ;;  %5527 = vmatpush3.xpose.msk.msra.mxu1 %vm714_vm2, %v5989_v47 }
 0x412   : > { %v2489_v33 = vpop.trf.xlu0  ;;  %5528 = vmatprep.subr.msk.mxu1 %vm714_vm2, %v5994_v48  ;;  %5543 = vmatpush3.msk.msra.mxu0 %vm234_vm0, %v5115_v59 }
 0x413   : > { %5503 = vmatprep.mubr.msk.f32.mxu1 %vm714_vm2, %v2489_v33  ;;  %5570 = vmatprep.subr.msk.mxu0 %vm714_vm2, %v5914_v10 }
 0x414   : > { %5504 = vmatmul.mubr.msk.f32.gmra.mxu1 %vm714_vm2, %v2521_v32  ;;  %5518 = vmatmul.mubr.msk.f32.gmra.mxu0 %vm209_vm1, %v5879_v5  ;;  %v2585_v34 = vpop.trf.xlu1 }
 0x415   : > { %5520 = vmatprep.mubr.msk.f32.mxu0 %vm209_vm1, %v5883_v6  ;;  %5529 = vmatpush3.xpose.msk.msra.mxu1 %vm714_vm2, %v5994_v48 }
 0x416   : > { %v2553_v35 = vpop.trf.xlu0  ;;  %5556 = vmatprep.subr.msk.mxu1 %vm234_vm0, %v5125_v46 }
 0x417   : > { %5506 = vmatprep.mubr.msk.f32.mxu1 %vm714_vm2, %v2553_v35 }
 0x418   : > { %5507 = vmatmul.mubr.msk.f32.gmra.mxu1 %vm714_vm2, %v2585_v34  ;;  %5521 = vmatmul.mubr.msk.f32.gmra.mxu0 %vm209_vm1, %v5891_v7  ;;  %v2649_v36 = vpop.trf.xlu1 }
 0x419   : > { %5523 = vmatprep.mubr.msk.f32.mxu0 %vm209_vm1, %v5895_v8 }
 0x41a   : > { %v2617_v37 = vpop.trf.xlu0 }
 0x41b   : > { %5509 = vmatprep.mubr.msk.f32.mxu1 %vm714_vm2, %v2617_v37 }
 0x41c   : > { %5510 = vmatmul.mubr.msk.f32.gmra.mxu1 %vm714_vm2, %v2649_v36  ;;  %5524 = vmatmul.mubr.msk.f32.gmra.mxu0 %vm209_vm1, %v5903_v9 }
 0x41d   : > { %5544 = vmatprep.mubr.msk.f32.mxu0 %vm209_vm1, %v5863_v2 }
 0x420   : > { %5545 = vmatmul.mubr.msk.f32.vlgmr.msra.gmra.mxu0 %vm209_vm1, %v5865_v3 }
 0x421   : > { %5547 = vmatprep.mubr.msk.f32.mxu0 %vm209_vm1, %v5867_v4  ;;  %5571 = vmatpush3.xpose.msk.msra.mxu0 %vm714_vm2, %v5914_v10 }
 0x422   : > { %5572 = vmatprep.subr.msk.mxu0 %vm714_vm2, %v5919_v11 }
 0x424   : > { %5548 = vmatmul.mubr.msk.f32.gmra.mxu0 %vm209_vm1, %v5879_v5 }
 0x425   : > { %5550 = vmatprep.mubr.msk.f32.mxu0 %vm209_vm1, %v5883_v6  ;;  %5573 = vmatpush3.xpose.msk.msra.mxu0 %vm714_vm2, %v5919_v11 }
 0x428   : > { %5551 = vmatmul.mubr.msk.f32.gmra.mxu0 %vm209_vm1, %v5891_v7 }
 0x429   : > { %5553 = vmatprep.mubr.msk.f32.mxu0 %vm209_vm1, %v5895_v8 }
 0x42c   : > { %5554 = vmatmul.mubr.msk.f32.gmra.mxu0 %vm209_vm1, %v5903_v9 }
 0x4c0   : > { %v6160_v38 = vpop.f32.mrf.mxu0 }
 0x4c2   : > { %v6162_v39 = vpop.f32.mrf.mxu0 }
 0x4c4   : > { %v6164_v40 = vpop.f32.mrf.mxu0 }
 0x4c6   : > { %v6166_v41 = vpop.f32.mrf.mxu0 }
 0x4c8   : > { %v6168_v42 = vpop.f32.mrf.mxu0 }
 0x4ca   : > { %v6170_v43 = vpop.f32.mrf.mxu0 }
 0x4cc   : > { %v6172_v44 = vpop.f32.mrf.mxu0 }
 0x4ce   : > { %v6174_v45 = vpop.f32.mrf.mxu0 }
 0x4d0   : > { %v5516_v49 = vpop.f32.mrf.mxu0 }
 0x4d1   : > { %2944 = vxpose.xlu1.b32.start.end [1/1] (short) (narrow) %v5516_v49, 8 }
 0x4d2   : > { %v2871_v50 = vpop.f32.mrf.mxu0 }
 0x4d3   : > { %2912 = vxpose.xlu0.b32.start.end [1/1] (short) (narrow) %v2871_v50, 8 }
 0x4d4   : > { %v5519_v51 = vpop.f32.mrf.mxu0 }
 0x4d5   : > { %3008 = vxpose.xlu1.b32.start.end [1/1] (short) (narrow) %v5519_v51, 8 }
 0x4d6   : > { %v2881_v52 = vpop.f32.mrf.mxu0 }
 0x4d7   : > { %2976 = vxpose.xlu0.b32.start.end [1/1] (short) (narrow) %v2881_v52, 8 }
 0x4d8   : > { %v5522_v53 = vpop.f32.mrf.mxu0 }
 0x4d9   : > { %3072 = vxpose.xlu1.b32.start.end [1/1] (short) (narrow) %v5522_v53, 8 }
 0x4da   : > { %v2891_v57 = vpop.f32.mrf.mxu0 }
 0x4db   : > { %3040 = vxpose.xlu0.b32.start.end [1/1] (short) (narrow) %v2891_v57, 8 }
 0x4dc   : > { %v5525_v58 = vpop.f32.mrf.mxu0 }
 0x4dd   : > { %3136 = vxpose.xlu1.b32.start.end [1/1] (short) (narrow) %v5525_v58, 8 }
 0x4de   : > { %v2901_v54 = vpop.f32.mrf.mxu0 }
 0x4df   : > { %3104 = vxpose.xlu0.b32.start.end [1/1] (short) (narrow) %v2901_v54, 8 }
 0x54d   : > { %v2960_v10 = vpop.trf.xlu1 }
 0x54f   : > { %v2928_v60 = vpop.trf.xlu0 }
 0x550   : > { %5530 = vmatprep.mubr.msk.f32.mxu1 %vm714_vm2, %v2928_v60 }
 0x551   : > { %5531 = vmatmul.mubr.msk.f32.vlgmr.msra.gmra.mxu1 %vm714_vm2, %v2960_v10  ;;  %v3024_v61 = vpop.trf.xlu1 }
 0x552   : > { %5557 = vmatpush3.msk.msra.mxu1 %vm234_vm0, %v5125_v46  ;;  %v5546_v46 = vpop.f32.mrf.mxu0 }
 0x553   : > { %v2992_v55 = vpop.trf.xlu0  ;;  %5586 = vmatprep.subr.msk.mxu1 %vm714_vm2, %v5936_v22 }
 0x554   : > { %5533 = vmatprep.mubr.msk.f32.mxu1 %vm714_vm2, %v2992_v55  ;;  %v3423_v49 = vpop.f32.mrf.mxu0 }
 0x555   : > { %5534 = vmatmul.mubr.msk.f32.gmra.mxu1 %vm714_vm2, %v3024_v61  ;;  %v3088_v11 = vpop.trf.xlu1 }
 0x556   : > { %v5549_v52 = vpop.f32.mrf.mxu0 }
 0x557   : > { %v3056_v56 = vpop.trf.xlu0 }
 0x558   : > { %5536 = vmatprep.mubr.msk.f32.mxu1 %vm714_vm2, %v3056_v56  ;;  %v3433_v58 = vpop.f32.mrf.mxu0 }
 0x559   : > { %5537 = vmatmul.mubr.msk.f32.gmra.mxu1 %vm714_vm2, %v3088_v11  ;;  %v3152_v62 = vpop.trf.xlu1 }
 0x55a   : > { %v5552_v59 = vpop.f32.mrf.mxu0 }
 0x55b   : > { %v3120_v63 = vpop.trf.xlu0 }
 0x55c   : > { %5539 = vmatprep.mubr.msk.f32.mxu1 %vm714_vm2, %v3120_v63  ;;  %v3443_v10 = vpop.f32.mrf.mxu0 }
 0x55d   : > { %5540 = vmatmul.mubr.msk.f32.gmra.mxu1 %vm714_vm2, %v3152_v62 }
 0x55e   : > { %5558 = vmatprep.mubr.msk.f32.mxu1 %vm209_vm1, %v5863_v2  ;;  %v5555_v60 = vpop.f32.mrf.mxu0 }
 0x560   : > { %v3453_v61 = vpop.f32.mrf.mxu0 }
 0x561   : > { %5559 = vmatmul.mubr.msk.f32.vlgmr.msra.gmra.mxu1 %vm209_vm1, %v5865_v3 }
 0x562   : > { %5561 = vmatprep.mubr.msk.f32.mxu1 %vm209_vm1, %v5867_v4  ;;  %5587 = vmatpush3.xpose.msk.msra.mxu1 %vm714_vm2, %v5936_v22  ;;  %v5502_v22 = vpop.f32.mrf.mxu1 }
 0x563   : > { %5588 = vmatprep.subr.msk.mxu1 %vm714_vm2, %v5945_v26  ;;  %v2767_v16 = vadd.f32 %v5502_v22, %v6160_v38 }
 0x564   : > { %v2761_v0 = vpop.f32.mrf.mxu1 }
 0x565   : > { %5562 = vmatmul.mubr.msk.f32.gmra.mxu1 %vm209_vm1, %v5879_v5  ;;  %v2762_v18 = vadd.f32 %v2761_v0, %v6162_v39 }
 0x566   : > { %5564 = vmatprep.mubr.msk.f32.mxu1 %vm209_vm1, %v5883_v6  ;;  %5589 = vmatpush3.xpose.msk.msra.mxu1 %vm714_vm2, %v5945_v26  ;;  %v5505_v1 = vpop.f32.mrf.mxu1 }
 0x567   : > { %5616 = vmatprep.subr.msk.mxu1 %vm714_vm2, %v5989_v47  ;;  %v2777_v21 = vadd.f32 %v5505_v1, %v6164_v40 }
 0x568   : > { %v2771_v12 = vpop.f32.mrf.mxu1 }
 0x569   : > { %5565 = vmatmul.mubr.msk.f32.gmra.mxu1 %vm209_vm1, %v5891_v7  ;;  %v2772_v25 = vadd.f32 %v2771_v12, %v6166_v41 }
 0x56a   : > { %5567 = vmatprep.mubr.msk.f32.mxu1 %vm209_vm1, %v5895_v8  ;;  %v5508_v13 = vpop.f32.mrf.mxu1 }
 0x56b   : > { %v2787_v29 = vadd.f32 %v5508_v13, %v6168_v42  ;;  %v5157_v42 = vld [vmem:[%s6396_s1 + $0x20] sm:$0xf] }
 0x56c   : > { %v2781_v26 = vpop.f32.mrf.mxu1  ;;  %5602 = vmatprep.subr.msk.mxu0 %vm234_vm0, %v5157_v42 }
 0x56d   : > { %5568 = vmatmul.mubr.msk.f32.gmra.mxu1 %vm209_vm1, %v5903_v9  ;;  %v2782_v32 = vadd.f32 %v2781_v26, %v6170_v43 }
 0x56e   : > { %v5511_v14 = vpop.f32.mrf.mxu1 }
 0x56f   : > { %v2797_v35 = vadd.f32 %v5511_v14, %v6172_v44 }
 0x570   : > { %v2791_v15 = vpop.f32.mrf.mxu1 }
 0x571   : > { %v2792_v38 = vadd.f32 %v2791_v15, %v6174_v45 }
 0x611   : > { %v5532_v17 = vpop.f32.mrf.mxu1 }
 0x612   : > { %v3304_v19 = vadd.f32 %v5532_v17, %v2767_v16 }
 0x613   : > { %v3264_v20 = vpop.f32.mrf.mxu1 }
 0x614   : > { %5108 = vst.msk [vmem:[%s6092_s11 + $0x48] sm:$0xff] %vm1753_vm3, %v3304_v19  ;;  %v3303_v23 = vadd.f32 %v3264_v20, %v2762_v18 }
 0x615   : > { %v5535_v24 = vpop.f32.mrf.mxu1 }
 0x616   : > { %5107 = vst.msk [vmem:[%s6092_s11 + $0x40] sm:$0xff] %vm1753_vm3, %v3303_v23  ;;  %v3306_v27 = vadd.f32 %v5535_v24, %v2777_v21 }
 0x617   : > { %v3274_v28 = vpop.f32.mrf.mxu1 }
 0x618   : > { %5110 = vst.msk [vmem:[%s6092_s11 + $0x58] sm:$0xff] %vm1753_vm3, %v3306_v27  ;;  %v3305_v30 = vadd.f32 %v3274_v28, %v2772_v25 }
 0x619   : > { %v5538_v31 = vpop.f32.mrf.mxu1 }
 0x61a   : > { %5109 = vst.msk [vmem:[%s6092_s11 + $0x50] sm:$0xff] %vm1753_vm3, %v3305_v30  ;;  %v3308_v33 = vadd.f32 %v5538_v31, %v2787_v29 }
 0x61b   : > { %v3284_v34 = vpop.f32.mrf.mxu1 }
 0x61c   : > { %5112 = vst.msk [vmem:[%s6092_s11 + $0x68] sm:$0xff] %vm1753_vm3, %v3308_v33  ;;  %v3307_v36 = vadd.f32 %v3284_v34, %v2782_v32 }
 0x61d   : > { %v5541_v37 = vpop.f32.mrf.mxu1 }
 0x61e   : > { %5111 = vst.msk [vmem:[%s6092_s11 + $0x60] sm:$0xff] %vm1753_vm3, %v3307_v36  ;;  %v3310_v39 = vadd.f32 %v5541_v37, %v2797_v35 }
 0x61f   : > { %v3294_v40 = vpop.f32.mrf.mxu1 }
 0x620   : > { %5114 = vst.msk [vmem:[%s6092_s11 + $0x78] sm:$0xff] %vm1753_vm3, %v3310_v39  ;;  %v3309_v41 = vadd.f32 %v3294_v40, %v2792_v38 }
 0x621   : > { %v5560_v43 = vpop.f32.mrf.mxu1 }
 0x622   : > { %5113 = vst.msk [vmem:[%s6092_s11 + $0x70] sm:$0xff] %vm1753_vm3, %v3309_v41  ;;  %3608 = vxpose.xlu1.b32.start.end [1/1] (short) (narrow) %v5560_v43, 8 }
 0x623   : > { %v3535_v44 = vpop.f32.mrf.mxu1 }
 0x624   : > { %3576 = vxpose.xlu0.b32.start.end [1/1] (short) (narrow) %v3535_v44, 8 }
 0x625   : > { %v5563_v45 = vpop.f32.mrf.mxu1 }
 0x626   : > { %3672 = vxpose.xlu1.b32.start.end [1/1] (short) (narrow) %v5563_v45, 8 }
 0x627   : > { %v3545_v50 = vpop.f32.mrf.mxu1 }
 0x628   : > { %3640 = vxpose.xlu0.b32.start.end [1/1] (short) (narrow) %v3545_v50, 8 }
 0x629   : > { %v5566_v51 = vpop.f32.mrf.mxu1 }
 0x62a   : > { %3736 = vxpose.xlu1.b32.start.end [1/1] (short) (narrow) %v5566_v51, 8 }
 0x62b   : > { %v3555_v53 = vpop.f32.mrf.mxu1 }
 0x62c   : > { %3704 = vxpose.xlu0.b32.start.end [1/1] (short) (narrow) %v3555_v53, 8 }
 0x62d   : > { %v5569_v57 = vpop.f32.mrf.mxu1 }
 0x62e   : > { %3800 = vxpose.xlu1.b32.start.end [1/1] (short) (narrow) %v5569_v57, 8 }
 0x62f   : > { %v3565_v54 = vpop.f32.mrf.mxu1 }
 0x630   : > { %3768 = vxpose.xlu0.b32.start.end [1/1] (short) (narrow) %v3565_v54, 8 }
 0x632   : > { %3999 = vxpose.xlu1.b32.start.end [1/1] (short) (narrow) %v5546_v46, 8 }
 0x634   : > { %3967 = vxpose.xlu0.b32.start.end [1/1] (short) (narrow) %v3423_v49, 8 }
 0x636   : > { %4063 = vxpose.xlu1.b32.start.end [1/1] (short) (narrow) %v5549_v52, 8 }
 0x638   : > { %4031 = vxpose.xlu0.b32.start.end [1/1] (short) (narrow) %v3433_v58, 8 }
 0x63a   : > { %4127 = vxpose.xlu1.b32.start.end [1/1] (short) (narrow) %v5552_v59, 8 }
 0x63c   : > { %4095 = vxpose.xlu0.b32.start.end [1/1] (short) (narrow) %v3443_v10, 8 }
 0x63e   : > { %4191 = vxpose.xlu1.b32.start.end [1/1] (short) (narrow) %v5555_v60, 8 }
 0x640   : > { %4159 = vxpose.xlu0.b32.start.end [1/1] (short) (narrow) %v3453_v61, 8 }
 0x69e   : > { %v3624_v55 = vpop.trf.xlu1 }
 0x6a0   : > { %v3592_v11 = vpop.trf.xlu0 }
 0x6a1   : > { %5574 = vmatprep.mubr.msk.f32.mxu0 %vm714_vm2, %v3592_v11 }
 0x6a2   : > { %5575 = vmatmul.mubr.msk.f32.vlgmr.msra.gmra.mxu0 %vm714_vm2, %v3624_v55  ;;  %v3688_v56 = vpop.trf.xlu1 }
 0x6a3   : > { %5603 = vmatpush3.msk.msra.mxu0 %vm234_vm0, %v5157_v42 }
 0x6a4   : > { %v3656_v62 = vpop.trf.xlu0 }
 0x6a5   : > { %5577 = vmatprep.mubr.msk.f32.mxu0 %vm714_vm2, %v3656_v62 }
 0x6a6   : > { %5578 = vmatmul.mubr.msk.f32.gmra.mxu0 %vm714_vm2, %v3688_v56  ;;  %v3752_v63 = vpop.trf.xlu1 }
 0x6a8   : > { %v3720_v22 = vpop.trf.xlu0 }
 0x6a9   : > { %5580 = vmatprep.mubr.msk.f32.mxu0 %vm714_vm2, %v3720_v22 }
 0x6aa   : > { %5581 = vmatmul.mubr.msk.f32.gmra.mxu0 %vm714_vm2, %v3752_v63  ;;  %v3816_v0 = vpop.trf.xlu1 }
 0x6ac   : > { %v3784_v1 = vpop.trf.xlu0 }
 0x6ad   : > { %5583 = vmatprep.mubr.msk.f32.mxu0 %vm714_vm2, %v3784_v1 }
 0x6ae   : > { %5584 = vmatmul.mubr.msk.f32.gmra.mxu0 %vm714_vm2, %v3816_v0  ;;  %v4015_v12 = vpop.trf.xlu1 }
 0x6af   : > { %5604 = vmatprep.mubr.msk.f32.mxu0 %vm209_vm1, %v5863_v2 }
 0x6b0   : > { %v3983_v13 = vpop.trf.xlu0 }
 0x6b1   : > { %5590 = vmatprep.mubr.msk.f32.mxu1 %vm714_vm2, %v3983_v13 }
 0x6b2   : > { %5591 = vmatmul.mubr.msk.f32.vlgmr.msra.gmra.mxu1 %vm714_vm2, %v4015_v12  ;;  %5605 = vmatmul.mubr.msk.f32.vlgmr.msra.gmra.mxu0 %vm209_vm1, %v5865_v3  ;;  %v4079_v26 = vpop.trf.xlu1 }
 0x6b3   : > { %5607 = vmatprep.mubr.msk.f32.mxu0 %vm209_vm1, %v5867_v4  ;;  %5617 = vmatpush3.xpose.msk.msra.mxu1 %vm714_vm2, %v5989_v47 }
 0x6b4   : > { %v4047_v14 = vpop.trf.xlu0  ;;  %5618 = vmatprep.subr.msk.mxu1 %vm714_vm2, %v5994_v48 }
 0x6b5   : > { %5593 = vmatprep.mubr.msk.f32.mxu1 %vm714_vm2, %v4047_v14 }
 0x6b6   : > { %5594 = vmatmul.mubr.msk.f32.gmra.mxu1 %vm714_vm2, %v4079_v26  ;;  %5608 = vmatmul.mubr.msk.f32.gmra.mxu0 %vm209_vm1, %v5879_v5  ;;  %v4143_v2 = vpop.trf.xlu1 }
 0x6b7   : > { %5610 = vmatprep.mubr.msk.f32.mxu0 %vm209_vm1, %v5883_v6  ;;  %5619 = vmatpush3.xpose.msk.msra.mxu1 %vm714_vm2, %v5994_v48 }
 0x6b8   : > { %v4111_v3 = vpop.trf.xlu0 }
 0x6b9   : > { %5596 = vmatprep.mubr.msk.f32.mxu1 %vm714_vm2, %v4111_v3 }
 0x6ba   : > { %5597 = vmatmul.mubr.msk.f32.gmra.mxu1 %vm714_vm2, %v4143_v2  ;;  %5611 = vmatmul.mubr.msk.f32.gmra.mxu0 %vm209_vm1, %v5891_v7  ;;  %v4207_v4 = vpop.trf.xlu1 }
 0x6bb   : > { %5613 = vmatprep.mubr.msk.f32.mxu0 %vm209_vm1, %v5895_v8 }
 0x6bc   : > { %v4175_v5 = vpop.trf.xlu0 }
 0x6bd   : > { %5599 = vmatprep.mubr.msk.f32.mxu1 %vm714_vm2, %v4175_v5 }
 0x6be   : > { %5600 = vmatmul.mubr.msk.f32.gmra.mxu1 %vm714_vm2, %v4207_v4  ;;  %5614 = vmatmul.mubr.msk.f32.gmra.mxu0 %vm209_vm1, %v5903_v9 }
 0x762   : > { %v5576_v6 = vpop.f32.mrf.mxu0 }
 0x764   : > { %v3928_v47 = vpop.f32.mrf.mxu0 }
 0x766   : > { %v5579_v48 = vpop.f32.mrf.mxu0 }
 0x768   : > { %v3938_v15 = vpop.f32.mrf.mxu0 }
 0x76a   : > { %v5582_v16 = vpop.f32.mrf.mxu0 }
 0x76c   : > { %v3948_v17 = vpop.f32.mrf.mxu0 }
 0x76e   : > { %v6309_v18 = vpop.f32.mrf.mxu0 }
 0x770   : > { %v6311_v7 = vpop.f32.mrf.mxu0 }
 0x772   : > { %v5606_v8 = vpop.f32.mrf.mxu0  ;;  %v5592_v35 = vpop.f32.mrf.mxu1 }
 0x773   : > { %4502 = vxpose.xlu1.b32.start.end [1/1] (short) (narrow) %v5606_v8, 8  ;;  %v4325_v43 = vadd.f32 %v5592_v35, %v5576_v6 }
 0x774   : > { %v4429_v19 = vpop.f32.mrf.mxu0  ;;  %v4319_v36 = vpop.f32.mrf.mxu1 }
 0x775   : > { %4470 = vxpose.xlu0.b32.start.end [1/1] (short) (narrow) %v4429_v19, 8  ;;  %v4320_v44 = vadd.f32 %v4319_v36, %v3928_v47 }
 0x776   : > { %v5609_v20 = vpop.f32.mrf.mxu0  ;;  %v5595_v37 = vpop.f32.mrf.mxu1 }
 0x777   : > { %4566 = vxpose.xlu1.b32.start.end [1/1] (short) (narrow) %v5609_v20, 8  ;;  %v4335_v50 = vadd.f32 %v5595_v37, %v5579_v48 }
 0x778   : > { %v4439_v21 = vpop.f32.mrf.mxu0  ;;  %v4329_v38 = vpop.f32.mrf.mxu1 }
 0x779   : > { %4534 = vxpose.xlu0.b32.start.end [1/1] (short) (narrow) %v4439_v21, 8  ;;  %v4330_v53 = vadd.f32 %v4329_v38, %v3938_v15 }
 0x77a   : > { %v5612_v23 = vpop.f32.mrf.mxu0  ;;  %v5598_v39 = vpop.f32.mrf.mxu1 }
 0x77b   : > { %4630 = vxpose.xlu1.b32.start.end [1/1] (short) (narrow) %v5612_v23, 8  ;;  %v4345_v54 = vadd.f32 %v5598_v39, %v5582_v16 }
 0x77c   : > { %v4449_v9 = vpop.f32.mrf.mxu0  ;;  %v4339_v40 = vpop.f32.mrf.mxu1 }
 0x77d   : > { %4598 = vxpose.xlu0.b32.start.end [1/1] (short) (narrow) %v4449_v9, 8  ;;  %v4340_v60 = vadd.f32 %v4339_v40, %v3948_v17 }
 0x77e   : > { %v5615_v24 = vpop.f32.mrf.mxu0  ;;  %v5601_v41 = vpop.f32.mrf.mxu1 }
 0x77f   : > { %4694 = vxpose.xlu1.b32.start.end [1/1] (short) (narrow) %v5615_v24, 8  ;;  %v4355_v11 = vadd.f32 %v5601_v41, %v6309_v18 }
 0x780   : > { %v4459_v25 = vpop.f32.mrf.mxu0  ;;  %v4349_v42 = vpop.f32.mrf.mxu1 }
 0x781   : > { %4662 = vxpose.xlu0.b32.start.end [1/1] (short) (narrow) %v4459_v25, 8  ;;  %v4350_v63 = vadd.f32 %v4349_v42, %v6311_v7 }
 0x7ef   : > { %v4518_v27 = vpop.trf.xlu1 }
 0x7f1   : > { %v4486_v28 = vpop.trf.xlu0 }
 0x7f2   : > { %5620 = vmatprep.mubr.msk.f32.mxu1 %vm714_vm2, %v4486_v28 }
 0x7f3   : > { %5621 = vmatmul.mubr.msk.f32.vlgmr.msra.gmra.mxu1 %vm714_vm2, %v4518_v27  ;;  %v4582_v29 = vpop.trf.xlu1 }
 0x7f5   : > { %v4550_v30 = vpop.trf.xlu0 }
 0x7f6   : > { %5623 = vmatprep.mubr.msk.f32.mxu1 %vm714_vm2, %v4550_v30 }
 0x7f7   : > { %5624 = vmatmul.mubr.msk.f32.gmra.mxu1 %vm714_vm2, %v4582_v29  ;;  %v4646_v31 = vpop.trf.xlu1 }
 0x7f9   : > { %v4614_v32 = vpop.trf.xlu0 }
 0x7fa   : > { %5626 = vmatprep.mubr.msk.f32.mxu1 %vm714_vm2, %v4614_v32 }
 0x7fb   : > { %5627 = vmatmul.mubr.msk.f32.gmra.mxu1 %vm714_vm2, %v4646_v31  ;;  %v4710_v33 = vpop.trf.xlu1 }
 0x7fd   : > { %v4678_v34 = vpop.trf.xlu0 }
 0x7fe   : > { %5629 = vmatprep.mubr.msk.f32.mxu1 %vm714_vm2, %v4678_v34 }
 0x7ff   : > { %5630 = vmatmul.mubr.msk.f32.gmra.mxu1 %vm714_vm2, %v4710_v33 }
 0x8b3   : > { %v5622_v46 = vpop.f32.mrf.mxu1 }
 0x8b4   : > { %v4862_v45 = vadd.f32 %v5622_v46, %v4325_v43 }
 0x8b5   : > { %v4822_v49 = vpop.f32.mrf.mxu1 }
 0x8b6   : > { %5180 = vst.msk [vmem:[%s6092_s11 + $0x88] sm:$0xff] %vm1753_vm3, %v4862_v45  ;;  %v4861_v51 = vadd.f32 %v4822_v49, %v4320_v44 }
 0x8b7   : > { %v5625_v52 = vpop.f32.mrf.mxu1 }
 0x8b8   : > { %5179 = vst.msk [vmem:[%s6092_s11 + $0x80] sm:$0xff] %vm1753_vm3, %v4861_v51  ;;  %v4864_v57 = vadd.f32 %v5625_v52, %v4335_v50 }
 0x8b9   : > { %v4832_v58 = vpop.f32.mrf.mxu1 }
 0x8ba   : > { %5182 = vst.msk [vmem:[%s6092_s11 + $0x98] sm:$0xff] %vm1753_vm3, %v4864_v57  ;;  %v4863_v59 = vadd.f32 %v4832_v58, %v4330_v53 }
 0x8bb   : > { %v5628_v10 = vpop.f32.mrf.mxu1 }
 0x8bc   : > { %5181 = vst.msk [vmem:[%s6092_s11 + $0x90] sm:$0xff] %vm1753_vm3, %v4863_v59  ;;  %v4866_v61 = vadd.f32 %v5628_v10, %v4345_v54 }
 0x8bd   : > { %v4842_v55 = vpop.f32.mrf.mxu1 }
 0x8be   : > { %5184 = vst.msk [vmem:[%s6092_s11 + $0xa8] sm:$0xff] %vm1753_vm3, %v4866_v61  ;;  %v4865_v56 = vadd.f32 %v4842_v55, %v4340_v60 }
 0x8bf   : > { %v5631_v62 = vpop.f32.mrf.mxu1 }
 0x8c0   : > { %5183 = vst.msk [vmem:[%s6092_s11 + $0xa0] sm:$0xff] %vm1753_vm3, %v4865_v56  ;;  %v4868_v22 = vadd.f32 %v5631_v62, %v4355_v11 }
 0x8c1   : > { %v4852_v0 = vpop.f32.mrf.mxu1 }
 0x8c2   : > { %5186 = vst.msk [vmem:[%s6092_s11 + $0xb8] sm:$0xff] %vm1753_vm3, %v4868_v22  ;;  %v4867_v1 = vadd.f32 %v4852_v0, %v4350_v63 }
 0x8c4   : > { %5185 = vst.msk [vmem:[%s6092_s11 + $0xb0] sm:$0xff] %vm1753_vm3, %v4867_v1 }
 0x8c5   : > { %5705 = shalt.err (!%p5702_p5)
}
 0x8c6   : > { %s5706_s9 = scalar_lea.hbm %s6340_s7, 3072  ;;  %s5710_s23 = scalar_lea.hbm %s6398_s3, 6144 }
 0x8c7   : > { %p5707_p6 = scmp.ne.s32.totalorder %s6340_s7, %s5706_s9  ;;  %p5711_p10 = scmp.lt.s32.totalorder %s6340_s7, %s6398_s3 }
 0x8c8   : > { %p5712_p11 = scmp.lt.s32.totalorder %s5710_s23, %s5706_s9 }
 0x8c9   : > { %p5708_p7 = pnand %p5707_p6, %p5833_p4 }
 0x8ca   : > { %p5713_p12 = por %p5712_p11, %p5711_p10 }
 0x8cb   : > { %p5709_p9 = pneg %p5708_p7 }
 0x8cd   : > { %p5714_p13 = pnand %p5713_p12, %p5709_p9 }
 0x8cf   : > { %5717 = shalt.err (!%p5714_p13)
}
 0x8d0   : > { %s5771_s28 = smov 128   ;;  %s5772_s29 = smov 8  }
 0x8d1   : > { %5634 = dma.vmem_to_hbm [thread:$0]  (%p5833_p4), %s6342_s4, 3072, %s6340_s7, %s6350_s15, %s5771_s28, %s5771_s28, %s5772_s29  }
 0x8d2 PF: > { %p5640_p0 = scmp.ge.s32.totalorder %s5768_s17, 2  ;;  %s4909_s30 = sand.u32 1, %s5748_s12  }
 0x8d3   : > { %s4910_s5 = scalar_lea.sflag [#allocation3], %s4909_s30 }
 0x8d4   : > { %p5637_p1 = pnand %p5640_p0, %p5840_p8 }
 0x8d6   : > { %p5638_p2 = pneg %p5637_p1 }
 0x8d8   : > { %5743 = dma.done.wait (%p5638_p2), %s4910_s5, 3072  }
 0x8d9   : > { %5745 = vsyncadd (%p5638_p2), %s4910_s5, 4294964224  ;;  %s16_s17 = sadd.s32 1, %s5768_s17   ;;  %s6401_s12 = smov %s5752_s13 }
 0x8da   : > { %p13_p3 = scmp.ge.s32.totalorder %s16_s17, 4   ;;  %s6402_s13 = smov %s5756_s14 }
 0x8db   : > { %s6403_s14 = smov %s5846_s25  ;;  %s6404_s15 = smov %s5764_s16 }
 0x8dc   : > { %s6405_s16 = smov %s6407_s20  ;;  %15 = sbr.rel (!%p13_p3) target bundleno = 4 (0x4), region = 79 }
 0x8e1   :  { %4915 = vsyncpa [#allocation3], 1 }
 0x8e2   :  { %4917 = vsyncpa [#allocation3 + $0x1], 1 }

</bundles_post_ra>
